<compile_context>
chip_gen: v5e
topology: v5e:2x2
jax: 0.10.0
libtpu: 0.0.40
codegen_flags: <defaults>
</compile_context>

<pallas_src>
import functools

import jax
import jax.numpy as jnp
import numpy as np
from jax import lax
from jax.experimental import pallas as pl
from jax.experimental.pallas import tpu as pltpu

D_MODEL = 128            # fixed by AttentionLayer() default inside EncoderLayer
N_HEADS = 8
D_HEAD = D_MODEL // N_HEADS
D_FF = 4 * D_MODEL
EPS = 1e-5               # PyTorch LayerNorm default

PARAM_ORDER = ("wq", "bq", "wk", "bk", "wv", "bv", "wo", "bo",
               "w1", "b1", "w2", "b2", "g1", "be1", "g2", "be2")


def _layer_norm(x, gamma, beta):
    mean = jnp.mean(x, axis=-1, keepdims=True)
    var = jnp.mean((x - mean) ** 2, axis=-1, keepdims=True)
    return (x - mean) * lax.rsqrt(var + EPS) * gamma + beta


def _bf16_dot(a, w, b):
    """bf16 MXU matmul with f32 accumulation and f32 bias add."""
    return jnp.dot(a.astype(jnp.bfloat16), w,
                   preferred_element_type=jnp.float32) + b


def encoder_layer_kernel(use_gate,
                         x_ref,
                         wqkv_ref, bqkv_ref, wo_ref, bo_ref,
                         w1_ref, b1_ref, w2_ref, b2_ref,
                         g1_ref, be1_ref, g2_ref, be2_ref,
                         out_ref, attn_ref):
    TB, L, Dm = x_ref.shape
    R = TB * L
    BH = TB * N_HEADS
    bf16 = jnp.bfloat16

    # Row-blocked activations: (TB, L, Dm) -> (TB*L, Dm) for all dense matmuls.
    x2 = x_ref[...].astype(jnp.float32).reshape(R, Dm)

    # --- fused q/k/v projection: one (R,128)x(128,384) bf16 MXU matmul ---
    # (1/sqrt(Dh) softmax scale is pre-folded into the wq/bq columns.)
    qkv = _bf16_dot(x2, wqkv_ref[...], bqkv_ref[...])
    q2 = qkv[:, :Dm]
    k2 = qkv[:, Dm:2 * Dm]
    v2 = qkv[:, 2 * Dm:]

    def to_heads(m):
        # (R, Dm) -> (TB, Dm, L) -> (TB*H, Dh, L): sublane-splitting reshapes
        # and batch-preserving last-two-dim transposes only (cheap relayouts).
        return jnp.transpose(m.reshape(TB, L, Dm), (0, 2, 1)).reshape(BH, D_HEAD, L)

    q_t = to_heads(q2)
    k_t = to_heads(k2)
    v_t = to_heads(v2)
    q_h = jnp.transpose(q_t, (0, 2, 1))            # (TB*H, L, Dh)

    # --- FullAttention: all batches & heads in one batched einsum each ---
    s = jnp.einsum("bld,bds->bls", q_h.astype(bf16), k_t.astype(bf16),
                   preferred_element_type=jnp.float32)          # (TB*H, L, L)
    s = s - jnp.max(s, axis=-1, keepdims=True)
    e = jnp.exp(s)
    a = e * pl.reciprocal(jnp.sum(e, axis=-1, keepdims=True), approx=True)
    attn_ref[...] = a.reshape(TB, N_HEADS, L, L).astype(attn_ref.dtype)

    ctx = jnp.einsum("bls,bds->bdl", a.astype(bf16), v_t.astype(bf16),
                     preferred_element_type=jnp.float32)        # (TB*H, Dh, L)
    ctx2d = jnp.transpose(ctx.reshape(TB, Dm, L), (0, 2, 1)).reshape(R, Dm)

    attn_out = _bf16_dot(ctx2d, wo_ref[...], bo_ref[...])

    # --- residual + norm1 (dropout = identity in eval mode) ---
    xn = _layer_norm(x2 + attn_out, g1_ref[...], be1_ref[...])

    # --- conv1 (1x1) -> relu -> conv2 (1x1)  ==  pointwise MLP ---
    y = jnp.maximum(_bf16_dot(xn, w1_ref[...], b1_ref[...]), 0.0)
    y = _bf16_dot(y, w2_ref[...], b2_ref[...])

    # --- chunk, residual, norm2, optional gate ---
    z = _layer_norm(xn + y[:, :Dm], g2_ref[...], be2_ref[...])
    if use_gate:
        z = z * jax.nn.sigmoid(y[:, Dm:])
    out_ref[...] = z.reshape(TB, L, Dm).astype(out_ref.dtype)


def _pick_tb(B, L):
    """Largest batch-block that divides B, targets >=256 rows per grid step,
    and keeps the per-step (double-buffered) VMEM estimate modest."""
    best = 1
    for tb in range(1, B + 1):
        if B % tb:
            continue
        rows = tb * L
        attn_bytes = 2 * tb * N_HEADS * L * L * 4          # attn prob output block
        act_bytes = 10 * rows * D_MODEL * 4                # qkv/ctx/xn/residuals
        ffn_bytes = 2 * rows * (D_FF + 2 * D_MODEL) * 4
        if tb > 16 or (attn_bytes + act_bytes + ffn_bytes) > 24 * (1 << 20):
            break
        best = tb
        if rows >= 256:
            break
    return best


def encoder_layer(x, params, use_gate=False):
    B, L, Dm = x.shape
    assert Dm == D_MODEL
    TB = _pick_tb(B, L)

    # Fold the 1/sqrt(Dh) softmax scale into the query projection (exact, since
    # scale = 0.25 is a power of two) and fuse q/k/v weights into one matmul.
    scale = 1.0 / float(np.sqrt(D_HEAD))
    wq = (params["wq"].astype(jnp.float32) * scale).astype(params["wq"].dtype)
    bq = params["bq"] * scale
    wqkv = jnp.concatenate([wq, params["wk"], params["wv"]], axis=1)
    bqkv = jnp.concatenate([bq, params["bk"], params["bv"]], axis=1)

    flat = [wqkv, bqkv, params["wo"], params["bo"],
            params["w1"], params["b1"], params["w2"], params["b2"],
            params["g1"], params["be1"], params["g2"], params["be2"]]

    def full_spec(arr):
        nd = arr.ndim
        return pl.BlockSpec(arr.shape, lambda b, _nd=nd: (0,) * _nd)

    in_specs = [pl.BlockSpec((TB, L, Dm), lambda b: (b, 0, 0))]
    in_specs += [full_spec(a) for a in flat]
    out_specs = [
        pl.BlockSpec((TB, L, Dm), lambda b: (b, 0, 0)),
        pl.BlockSpec((TB, N_HEADS, L, L), lambda b: (b, 0, 0, 0)),
    ]
    out_shape = [
        jax.ShapeDtypeStruct((B, L, Dm), x.dtype),
        jax.ShapeDtypeStruct((B, N_HEADS, L, L), jnp.float32),
    ]
    kernel = functools.partial(encoder_layer_kernel, use_gate)
    return pl.pallas_call(
        kernel,
        grid=(B // TB,),
        in_specs=in_specs,
        out_specs=out_specs,
        out_shape=out_shape,
        compiler_params=pltpu.CompilerParams(
            dimension_semantics=("parallel",),
            vmem_limit_bytes=64 * 1024 * 1024),
    )(x, *flat)


def init_params(key):
    ks = jax.random.split(key, 16)

    def w(k, din, dout, s=0.02):
        # Linear / Conv1d(k=1) weights stored pre-transposed (in, out), bf16.
        return (s * jax.random.normal(k, (din, dout), jnp.float32)).astype(jnp.bfloat16)

    def b(k, dout, s=0.01):
        return s * jax.random.normal(k, (1, dout), jnp.float32)

    return {
        "wq": w(ks[0], D_MODEL, D_MODEL), "bq": b(ks[1], D_MODEL),
        "wk": w(ks[2], D_MODEL, D_MODEL), "bk": b(ks[3], D_MODEL),
        "wv": w(ks[4], D_MODEL, D_MODEL), "bv": b(ks[5], D_MODEL),
        "wo": w(ks[6], D_MODEL, D_MODEL), "bo": b(ks[7], D_MODEL),
        "w1": w(ks[8], D_MODEL, D_FF), "b1": b(ks[9], D_FF),
        "w2": w(ks[10], D_FF, 2 * D_MODEL), "b2": b(ks[11], 2 * D_MODEL),
        "g1": jnp.ones((1, D_MODEL), jnp.float32),
        "be1": jnp.zeros((1, D_MODEL), jnp.float32),
        "g2": jnp.ones((1, D_MODEL), jnp.float32),
        "be2": jnp.zeros((1, D_MODEL), jnp.float32),
    }


def reference(x, p, use_gate=False):
    """Pure-JAX mirror of the PyTorch forward (eval mode), same bf16 casts."""
    B, L, Dm = x.shape
    bf16 = jnp.bfloat16
    xf = x.astype(jnp.float32)
    q = _bf16_dot(xf, p["wq"], p["bq"]).reshape(B, L, N_HEADS, D_HEAD)
    k = _bf16_dot(xf, p["wk"], p["bk"]).reshape(B, L, N_HEADS, D_HEAD)
    v = _bf16_dot(xf, p["wv"], p["bv"]).reshape(B, L, N_HEADS, D_HEAD)
    scores = jnp.einsum("blhe,bshe->bhls", q.astype(bf16), k.astype(bf16),
                        preferred_element_type=jnp.float32) / np.sqrt(D_HEAD)
    A = jax.nn.softmax(scores, axis=-1)
    V = jnp.einsum("bhls,bshd->blhd", A.astype(bf16), v.astype(bf16),
                   preferred_element_type=jnp.float32).reshape(B, L, Dm)
    attn_out = _bf16_dot(V, p["wo"], p["bo"])
    xn = _layer_norm(xf + attn_out, p["g1"], p["be1"])
    y = jax.nn.relu(_bf16_dot(xn, p["w1"], p["b1"]))
    y = _bf16_dot(y, p["w2"], p["b2"])
    out, gate = jnp.split(y, 2, axis=-1)
    out = _layer_norm(xn + out, p["g2"], p["be2"])
    if use_gate:
        out = out * jax.nn.sigmoid(gate)
    return out, A


if __name__ == "__main__":
    B, L = 2, 8
    key = jax.random.PRNGKey(0)
    kx, kp = jax.random.split(key)
    x = jax.random.normal(kx, (B, L, D_MODEL), jnp.float32)
    params = init_params(kp)

    out, attn = encoder_layer(x, params, use_gate=False)
    out = jax.block_until_ready(out)
    attn = jax.block_until_ready(attn)

    ref_out, ref_attn = reference(x, params, use_gate=False)
    # bf16 matmul inputs + approximate softmax reciprocal -> loosened tolerance.
    np.testing.assert_allclose(np.asarray(out), np.asarray(ref_out),
                               rtol=2e-2, atol=2e-2)
    np.testing.assert_allclose(np.asarray(attn), np.asarray(ref_attn),
                               rtol=5e-2, atol=5e-3)
    print("KERNEL_OK")
</pallas_src>

<mosaic_0001>
module attributes {stable_mosaic.version = 11 : i64} {
  func.func @encoder_layer_kernel(%arg0: i32, %arg1: memref<2x8x128xf32, #tpu.memory_space<vmem>>, %arg2: memref<128x384xbf16, #tpu.memory_space<vmem>>, %arg3: memref<1x384xf32, #tpu.memory_space<vmem>>, %arg4: memref<128x128xbf16, #tpu.memory_space<vmem>>, %arg5: memref<1x128xf32, #tpu.memory_space<vmem>>, %arg6: memref<128x512xbf16, #tpu.memory_space<vmem>>, %arg7: memref<1x512xf32, #tpu.memory_space<vmem>>, %arg8: memref<512x256xbf16, #tpu.memory_space<vmem>>, %arg9: memref<1x256xf32, #tpu.memory_space<vmem>>, %arg10: memref<1x128xf32, #tpu.memory_space<vmem>>, %arg11: memref<1x128xf32, #tpu.memory_space<vmem>>, %arg12: memref<1x128xf32, #tpu.memory_space<vmem>>, %arg13: memref<1x128xf32, #tpu.memory_space<vmem>>, %arg14: memref<2x8x128xf32, #tpu.memory_space<vmem>>, %arg15: memref<2x8x8x8xf32, #tpu.memory_space<vmem>>) attributes {dimension_semantics = [#tpu.dimension_semantics<parallel>], iteration_bounds = array<i64: 1>, scalar_prefetch = 0 : i64, scratch_operands = 0 : i64, tpu.core_type = #tpu.core_type<tc>, window_params = [{transform_indices = @transform_0, window_bounds = array<i64: 2, 8, 128>}, {pipeline_mode = #tpu.pipeline_mode<synchronous>, transform_indices = @transform_1, window_bounds = array<i64: 128, 384>}, {pipeline_mode = #tpu.pipeline_mode<synchronous>, transform_indices = @transform_2, window_bounds = array<i64: 1, 384>}, {pipeline_mode = #tpu.pipeline_mode<synchronous>, transform_indices = @transform_3, window_bounds = array<i64: 128, 128>}, {pipeline_mode = #tpu.pipeline_mode<synchronous>, transform_indices = @transform_4, window_bounds = array<i64: 1, 128>}, {pipeline_mode = #tpu.pipeline_mode<synchronous>, transform_indices = @transform_5, window_bounds = array<i64: 128, 512>}, {pipeline_mode = #tpu.pipeline_mode<synchronous>, transform_indices = @transform_6, window_bounds = array<i64: 1, 512>}, {pipeline_mode = #tpu.pipeline_mode<synchronous>, transform_indices = @transform_7, window_bounds = array<i64: 512, 256>}, {pipeline_mode = #tpu.pipeline_mode<synchronous>, transform_indices = @transform_8, window_bounds = array<i64: 1, 256>}, {pipeline_mode = #tpu.pipeline_mode<synchronous>, transform_indices = @transform_9, window_bounds = array<i64: 1, 128>}, {pipeline_mode = #tpu.pipeline_mode<synchronous>, transform_indices = @transform_10, window_bounds = array<i64: 1, 128>}, {pipeline_mode = #tpu.pipeline_mode<synchronous>, transform_indices = @transform_11, window_bounds = array<i64: 1, 128>}, {pipeline_mode = #tpu.pipeline_mode<synchronous>, transform_indices = @transform_12, window_bounds = array<i64: 1, 128>}, {transform_indices = @transform_13, window_bounds = array<i64: 2, 8, 128>}, {transform_indices = @transform_14, window_bounds = array<i64: 2, 8, 8, 8>}]} {
    %c0 = arith.constant 0 : index
    %c0_0 = arith.constant 0 : index
    %c0_1 = arith.constant 0 : index
    %0 = vector.load %arg1[%c0, %c0_0, %c0_1] : memref<2x8x128xf32, #tpu.memory_space<vmem>>, vector<2x8x128xf32>
    %1 = vector.shape_cast %0 : vector<2x8x128xf32> to vector<16x128xf32>
    %c0_2 = arith.constant 0 : index
    %c0_3 = arith.constant 0 : index
    %2 = vector.load %arg2[%c0_2, %c0_3] : memref<128x384xbf16, #tpu.memory_space<vmem>>, vector<128x384xbf16>
    %c0_4 = arith.constant 0 : index
    %c0_5 = arith.constant 0 : index
    %3 = vector.load %arg3[%c0_4, %c0_5] : memref<1x384xf32, #tpu.memory_space<vmem>>, vector<1x384xf32>
    %4 = arith.truncf %1 : vector<16x128xf32> to vector<16x128xbf16>
    %cst = arith.constant dense<0.000000e+00> : vector<16x384xf32>
    %5 = tpu.matmul %4, %2, %cst {dimension_numbers = #tpu.dot_dimension_numbers<[1], [0], [0], [1], [0, 0, 1, 1], [], []>} : vector<16x128xbf16>, vector<128x384xbf16>, vector<16x384xf32> -> vector<16x384xf32>
    %6 = vector.broadcast %3 : vector<1x384xf32> to vector<16x384xf32>
    %7 = arith.addf %5, %6 : vector<16x384xf32>
    %8 = vector.extract_strided_slice %7 {offsets = [0, 0], sizes = [16, 128], strides = [1, 1]} : vector<16x384xf32> to vector<16x128xf32>
    %9 = vector.extract_strided_slice %7 {offsets = [0, 128], sizes = [16, 128], strides = [1, 1]} : vector<16x384xf32> to vector<16x128xf32>
    %10 = vector.extract_strided_slice %7 {offsets = [0, 256], sizes = [16, 128], strides = [1, 1]} : vector<16x384xf32> to vector<16x128xf32>
    %11 = vector.shape_cast %8 : vector<16x128xf32> to vector<2x8x128xf32>
    %12 = tpu.transpose %11, [0, 2, 1] : vector<2x8x128xf32> -> vector<2x128x8xf32>
    %13 = vector.shape_cast %12 : vector<2x128x8xf32> to vector<16x16x8xf32>
    %14 = vector.shape_cast %9 : vector<16x128xf32> to vector<2x8x128xf32>
    %15 = tpu.transpose %14, [0, 2, 1] : vector<2x8x128xf32> -> vector<2x128x8xf32>
    %16 = vector.shape_cast %15 : vector<2x128x8xf32> to vector<16x16x8xf32>
    %17 = vector.shape_cast %10 : vector<16x128xf32> to vector<2x8x128xf32>
    %18 = tpu.transpose %17, [0, 2, 1] : vector<2x8x128xf32> -> vector<2x128x8xf32>
    %19 = vector.shape_cast %18 : vector<2x128x8xf32> to vector<16x16x8xf32>
    %20 = tpu.transpose %13, [0, 2, 1] : vector<16x16x8xf32> -> vector<16x8x16xf32>
    %21 = arith.truncf %20 : vector<16x8x16xf32> to vector<16x8x16xbf16>
    %22 = arith.truncf %16 : vector<16x16x8xf32> to vector<16x16x8xbf16>
    "tpu.trace_start"() <{level = 10 : i32, message = "bld,bds->bls"}> : () -> ()
    %cst_6 = arith.constant dense<0.000000e+00> : vector<16x8x8xf32>
    %23 = tpu.matmul %21, %22, %cst_6 {dimension_numbers = #tpu.dot_dimension_numbers<[2], [1], [1], [2], [0, 0, 0, 1, 1, 2], [0], [0]>} : vector<16x8x16xbf16>, vector<16x16x8xbf16>, vector<16x8x8xf32> -> vector<16x8x8xf32>
    "tpu.trace_stop"() : () -> ()
    %cst_7 = arith.constant dense<0xFF800000> : vector<16x8xf32>
    %24 = vector.multi_reduction <maximumf>, %23, %cst_7 [2] : vector<16x8x8xf32> to vector<16x8xf32>
    %25 = vector.shape_cast %24 : vector<16x8xf32> to vector<16x8x1xf32>
    %26 = vector.broadcast %25 : vector<16x8x1xf32> to vector<16x8x8xf32>
    %27 = arith.subf %23, %26 : vector<16x8x8xf32>
    %28 = math.exp %27 : vector<16x8x8xf32>
    %cst_8 = arith.constant dense<0.000000e+00> : vector<16x8xf32>
    %29 = vector.multi_reduction <add>, %28, %cst_8 [2] : vector<16x8x8xf32> to vector<16x8xf32>
    %30 = vector.shape_cast %29 : vector<16x8xf32> to vector<16x8x1xf32>
    %31 = tpu.reciprocal %30 {approx = true} : vector<16x8x1xf32> -> vector<16x8x1xf32>
    %32 = vector.broadcast %31 : vector<16x8x1xf32> to vector<16x8x8xf32>
    %33 = arith.mulf %28, %32 : vector<16x8x8xf32>
    %34 = vector.shape_cast %33 : vector<16x8x8xf32> to vector<2x8x8x8xf32>
    %c0_9 = arith.constant 0 : index
    %c0_10 = arith.constant 0 : index
    %c0_11 = arith.constant 0 : index
    %c0_12 = arith.constant 0 : index
    %35 = vector.load %arg15[%c0_9, %c0_10, %c0_11, %c0_12] : memref<2x8x8x8xf32, #tpu.memory_space<vmem>>, vector<2x8x8x8xf32>
    tpu.vector_store %arg15[%c0_9, %c0_10, %c0_11, %c0_12], %34 {strides = array<i32>} : memref<2x8x8x8xf32, #tpu.memory_space<vmem>>, vector<2x8x8x8xf32>,
    %36 = arith.truncf %33 : vector<16x8x8xf32> to vector<16x8x8xbf16>
    %37 = arith.truncf %19 : vector<16x16x8xf32> to vector<16x16x8xbf16>
    "tpu.trace_start"() <{level = 10 : i32, message = "bls,bds->bdl"}> : () -> ()
    %cst_13 = arith.constant dense<0.000000e+00> : vector<16x16x8xf32>
    %38 = tpu.matmul %37, %36, %cst_13 {dimension_numbers = #tpu.dot_dimension_numbers<[2], [2], [1], [1], [0, 0, 0, 1, 1, 1], [0], [0]>} : vector<16x16x8xbf16>, vector<16x8x8xbf16>, vector<16x16x8xf32> -> vector<16x16x8xf32>
    "tpu.trace_stop"() : () -> ()
    %39 = vector.shape_cast %38 : vector<16x16x8xf32> to vector<2x128x8xf32>
    %40 = tpu.transpose %39, [0, 2, 1] : vector<2x128x8xf32> -> vector<2x8x128xf32>
    %41 = vector.shape_cast %40 : vector<2x8x128xf32> to vector<16x128xf32>
    %c0_14 = arith.constant 0 : index
    %c0_15 = arith.constant 0 : index
    %42 = vector.load %arg4[%c0_14, %c0_15] : memref<128x128xbf16, #tpu.memory_space<vmem>>, vector<128x128xbf16>
    %c0_16 = arith.constant 0 : index
    %c0_17 = arith.constant 0 : index
    %43 = vector.load %arg5[%c0_16, %c0_17] : memref<1x128xf32, #tpu.memory_space<vmem>>, vector<1x128xf32>
    %44 = arith.truncf %41 : vector<16x128xf32> to vector<16x128xbf16>
    %cst_18 = arith.constant dense<0.000000e+00> : vector<16x128xf32>
    %45 = tpu.matmul %44, %42, %cst_18 {dimension_numbers = #tpu.dot_dimension_numbers<[1], [0], [0], [1], [0, 0, 1, 1], [], []>} : vector<16x128xbf16>, vector<128x128xbf16>, vector<16x128xf32> -> vector<16x128xf32>
    %46 = vector.broadcast %43 : vector<1x128xf32> to vector<16x128xf32>
    %47 = arith.addf %45, %46 : vector<16x128xf32>
    %48 = arith.addf %1, %47 : vector<16x128xf32>
    %c0_19 = arith.constant 0 : index
    %c0_20 = arith.constant 0 : index
    %49 = vector.load %arg10[%c0_19, %c0_20] : memref<1x128xf32, #tpu.memory_space<vmem>>, vector<1x128xf32>
    %c0_21 = arith.constant 0 : index
    %c0_22 = arith.constant 0 : index
    %50 = vector.load %arg11[%c0_21, %c0_22] : memref<1x128xf32, #tpu.memory_space<vmem>>, vector<1x128xf32>
    %cst_23 = arith.constant dense<0.000000e+00> : vector<16xf32>
    %51 = vector.multi_reduction <add>, %48, %cst_23 [1] : vector<16x128xf32> to vector<16xf32>
    %52 = vector.shape_cast %51 : vector<16xf32> to vector<16x1xf32>
    %cst_24 = arith.constant 1.280000e+02 : f32
    %53 = vector.broadcast %cst_24 : f32 to vector<16x1xf32>
    %54 = arith.divf %52, %53 : vector<16x1xf32>
    %55 = vector.broadcast %54 : vector<16x1xf32> to vector<16x128xf32>
    %56 = arith.subf %48, %55 : vector<16x128xf32>
    %57 = arith.mulf %56, %56 : vector<16x128xf32>
    %cst_25 = arith.constant dense<0.000000e+00> : vector<16xf32>
    %58 = vector.multi_reduction <add>, %57, %cst_25 [1] : vector<16x128xf32> to vector<16xf32>
    %59 = vector.shape_cast %58 : vector<16xf32> to vector<16x1xf32>
    %cst_26 = arith.constant 1.280000e+02 : f32
    %60 = vector.broadcast %cst_26 : f32 to vector<16x1xf32>
    %61 = arith.divf %59, %60 : vector<16x1xf32>
    %62 = vector.broadcast %54 : vector<16x1xf32> to vector<16x128xf32>
    %63 = arith.subf %48, %62 : vector<16x128xf32>
    %cst_27 = arith.constant 9.99999974E-6 : f32
    %64 = vector.broadcast %cst_27 : f32 to vector<16x1xf32>
    %65 = arith.addf %61, %64 : vector<16x1xf32>
    %66 = math.rsqrt %65 : vector<16x1xf32>
    %67 = vector.broadcast %66 : vector<16x1xf32> to vector<16x128xf32>
    %68 = arith.mulf %63, %67 : vector<16x128xf32>
    %69 = vector.broadcast %49 : vector<1x128xf32> to vector<16x128xf32>
    %70 = arith.mulf %68, %69 : vector<16x128xf32>
    %71 = vector.broadcast %50 : vector<1x128xf32> to vector<16x128xf32>
    %72 = arith.addf %70, %71 : vector<16x128xf32>
    %c0_28 = arith.constant 0 : index
    %c0_29 = arith.constant 0 : index
    %73 = vector.load %arg6[%c0_28, %c0_29] : memref<128x512xbf16, #tpu.memory_space<vmem>>, vector<128x512xbf16>
    %c0_30 = arith.constant 0 : index
    %c0_31 = arith.constant 0 : index
    %74 = vector.load %arg7[%c0_30, %c0_31] : memref<1x512xf32, #tpu.memory_space<vmem>>, vector<1x512xf32>
    %75 = arith.truncf %72 : vector<16x128xf32> to vector<16x128xbf16>
    %cst_32 = arith.constant dense<0.000000e+00> : vector<16x512xf32>
    %76 = tpu.matmul %75, %73, %cst_32 {dimension_numbers = #tpu.dot_dimension_numbers<[1], [0], [0], [1], [0, 0, 1, 1], [], []>} : vector<16x128xbf16>, vector<128x512xbf16>, vector<16x512xf32> -> vector<16x512xf32>
    %77 = vector.broadcast %74 : vector<1x512xf32> to vector<16x512xf32>
    %78 = arith.addf %76, %77 : vector<16x512xf32>
    %cst_33 = arith.constant 0.000000e+00 : f32
    %79 = vector.broadcast %cst_33 : f32 to vector<16x512xf32>
    %80 = arith.maximumf %78, %79 : vector<16x512xf32>
    %c0_34 = arith.constant 0 : index
    %c0_35 = arith.constant 0 : index
    %81 = vector.load %arg8[%c0_34, %c0_35] : memref<512x256xbf16, #tpu.memory_space<vmem>>, vector<512x256xbf16>
    %c0_36 = arith.constant 0 : index
    %c0_37 = arith.constant 0 : index
    %82 = vector.load %arg9[%c0_36, %c0_37] : memref<1x256xf32, #tpu.memory_space<vmem>>, vector<1x256xf32>
    %83 = arith.truncf %80 : vector<16x512xf32> to vector<16x512xbf16>
    %cst_38 = arith.constant dense<0.000000e+00> : vector<16x256xf32>
    %84 = tpu.matmul %83, %81, %cst_38 {dimension_numbers = #tpu.dot_dimension_numbers<[1], [0], [0], [1], [0, 0, 1, 1], [], []>} : vector<16x512xbf16>, vector<512x256xbf16>, vector<16x256xf32> -> vector<16x256xf32>
    %85 = vector.broadcast %82 : vector<1x256xf32> to vector<16x256xf32>
    %86 = arith.addf %84, %85 : vector<16x256xf32>
    %87 = vector.extract_strided_slice %86 {offsets = [0, 0], sizes = [16, 128], strides = [1, 1]} : vector<16x256xf32> to vector<16x128xf32>
    %88 = arith.addf %72, %87 : vector<16x128xf32>
    %c0_39 = arith.constant 0 : index
    %c0_40 = arith.constant 0 : index
    %89 = vector.load %arg12[%c0_39, %c0_40] : memref<1x128xf32, #tpu.memory_space<vmem>>, vector<1x128xf32>
    %c0_41 = arith.constant 0 : index
    %c0_42 = arith.constant 0 : index
    %90 = vector.load %arg13[%c0_41, %c0_42] : memref<1x128xf32, #tpu.memory_space<vmem>>, vector<1x128xf32>
    %cst_43 = arith.constant dense<0.000000e+00> : vector<16xf32>
    %91 = vector.multi_reduction <add>, %88, %cst_43 [1] : vector<16x128xf32> to vector<16xf32>
    %92 = vector.shape_cast %91 : vector<16xf32> to vector<16x1xf32>
    %cst_44 = arith.constant 1.280000e+02 : f32
    %93 = vector.broadcast %cst_44 : f32 to vector<16x1xf32>
    %94 = arith.divf %92, %93 : vector<16x1xf32>
    %95 = vector.broadcast %94 : vector<16x1xf32> to vector<16x128xf32>
    %96 = arith.subf %88, %95 : vector<16x128xf32>
    %97 = arith.mulf %96, %96 : vector<16x128xf32>
    %cst_45 = arith.constant dense<0.000000e+00> : vector<16xf32>
    %98 = vector.multi_reduction <add>, %97, %cst_45 [1] : vector<16x128xf32> to vector<16xf32>
    %99 = vector.shape_cast %98 : vector<16xf32> to vector<16x1xf32>
    %cst_46 = arith.constant 1.280000e+02 : f32
    %100 = vector.broadcast %cst_46 : f32 to vector<16x1xf32>
    %101 = arith.divf %99, %100 : vector<16x1xf32>
    %102 = vector.broadcast %94 : vector<16x1xf32> to vector<16x128xf32>
    %103 = arith.subf %88, %102 : vector<16x128xf32>
    %cst_47 = arith.constant 9.99999974E-6 : f32
    %104 = vector.broadcast %cst_47 : f32 to vector<16x1xf32>
    %105 = arith.addf %101, %104 : vector<16x1xf32>
    %106 = math.rsqrt %105 : vector<16x1xf32>
    %107 = vector.broadcast %106 : vector<16x1xf32> to vector<16x128xf32>
    %108 = arith.mulf %103, %107 : vector<16x128xf32>
    %109 = vector.broadcast %89 : vector<1x128xf32> to vector<16x128xf32>
    %110 = arith.mulf %108, %109 : vector<16x128xf32>
    %111 = vector.broadcast %90 : vector<1x128xf32> to vector<16x128xf32>
    %112 = arith.addf %110, %111 : vector<16x128xf32>
    %113 = vector.shape_cast %112 : vector<16x128xf32> to vector<2x8x128xf32>
    %c0_48 = arith.constant 0 : index
    %c0_49 = arith.constant 0 : index
    %c0_50 = arith.constant 0 : index
    %114 = vector.load %arg14[%c0_48, %c0_49, %c0_50] : memref<2x8x128xf32, #tpu.memory_space<vmem>>, vector<2x8x128xf32>
    tpu.vector_store %arg14[%c0_48, %c0_49, %c0_50], %113 {strides = array<i32>} : memref<2x8x128xf32, #tpu.memory_space<vmem>>, vector<2x8x128xf32>,
    return
  }
  func.func @transform_0(%arg0: i32) -> (i32, i32, i32) {
    %c0_i32 = arith.constant 0 : i32
    %c0_i32_0 = arith.constant 0 : i32
    %c0_i32_1 = arith.constant 0 : i32
    return %arg0, %c0_i32, %c0_i32_0 : i32, i32, i32
  }
  func.func @transform_1(%arg0: i32) -> (i32, i32) {
    %c0_i32 = arith.constant 0 : i32
    %c0_i32_0 = arith.constant 0 : i32
    %c0_i32_1 = arith.constant 0 : i32
    return %c0_i32, %c0_i32_0 : i32, i32
  }
  func.func @transform_2(%arg0: i32) -> (i32, i32) {
    %c0_i32 = arith.constant 0 : i32
    %c0_i32_0 = arith.constant 0 : i32
    %c0_i32_1 = arith.constant 0 : i32
    return %c0_i32, %c0_i32_0 : i32, i32
  }
  func.func @transform_3(%arg0: i32) -> (i32, i32) {
    %c0_i32 = arith.constant 0 : i32
    %c0_i32_0 = arith.constant 0 : i32
    %c0_i32_1 = arith.constant 0 : i32
    return %c0_i32, %c0_i32_0 : i32, i32
  }
  func.func @transform_4(%arg0: i32) -> (i32, i32) {
    %c0_i32 = arith.constant 0 : i32
    %c0_i32_0 = arith.constant 0 : i32
    %c0_i32_1 = arith.constant 0 : i32
    return %c0_i32, %c0_i32_0 : i32, i32
  }
  func.func @transform_5(%arg0: i32) -> (i32, i32) {
    %c0_i32 = arith.constant 0 : i32
    %c0_i32_0 = arith.constant 0 : i32
    %c0_i32_1 = arith.constant 0 : i32
    return %c0_i32, %c0_i32_0 : i32, i32
  }
  func.func @transform_6(%arg0: i32) -> (i32, i32) {
    %c0_i32 = arith.constant 0 : i32
    %c0_i32_0 = arith.constant 0 : i32
    %c0_i32_1 = arith.constant 0 : i32
    return %c0_i32, %c0_i32_0 : i32, i32
  }
  func.func @transform_7(%arg0: i32) -> (i32, i32) {
    %c0_i32 = arith.constant 0 : i32
    %c0_i32_0 = arith.constant 0 : i32
    %c0_i32_1 = arith.constant 0 : i32
    return %c0_i32, %c0_i32_0 : i32, i32
  }
  func.func @transform_8(%arg0: i32) -> (i32, i32) {
    %c0_i32 = arith.constant 0 : i32
    %c0_i32_0 = arith.constant 0 : i32
    %c0_i32_1 = arith.constant 0 : i32
    return %c0_i32, %c0_i32_0 : i32, i32
  }
  func.func @transform_9(%arg0: i32) -> (i32, i32) {
    %c0_i32 = arith.constant 0 : i32
    %c0_i32_0 = arith.constant 0 : i32
    %c0_i32_1 = arith.constant 0 : i32
    return %c0_i32, %c0_i32_0 : i32, i32
  }
  func.func @transform_10(%arg0: i32) -> (i32, i32) {
    %c0_i32 = arith.constant 0 : i32
    %c0_i32_0 = arith.constant 0 : i32
    %c0_i32_1 = arith.constant 0 : i32
    return %c0_i32, %c0_i32_0 : i32, i32
  }
  func.func @transform_11(%arg0: i32) -> (i32, i32) {
    %c0_i32 = arith.constant 0 : i32
    %c0_i32_0 = arith.constant 0 : i32
    %c0_i32_1 = arith.constant 0 : i32
    return %c0_i32, %c0_i32_0 : i32, i32
  }
  func.func @transform_12(%arg0: i32) -> (i32, i32) {
    %c0_i32 = arith.constant 0 : i32
    %c0_i32_0 = arith.constant 0 : i32
    %c0_i32_1 = arith.constant 0 : i32
    return %c0_i32, %c0_i32_0 : i32, i32
  }
  func.func @transform_13(%arg0: i32) -> (i32, i32, i32) {
    %c0_i32 = arith.constant 0 : i32
    %c0_i32_0 = arith.constant 0 : i32
    %c0_i32_1 = arith.constant 0 : i32
    return %arg0, %c0_i32, %c0_i32_0 : i32, i32, i32
  }
  func.func @transform_14(%arg0: i32) -> (i32, i32, i32, i32) {
    %c0_i32 = arith.constant 0 : i32
    %c0_i32_0 = arith.constant 0 : i32
    %c0_i32_1 = arith.constant 0 : i32
    %c0_i32_2 = arith.constant 0 : i32
    return %arg0, %c0_i32, %c0_i32_0, %c0_i32_1 : i32, i32, i32, i32
  }
}

</mosaic_0001>

<bundles_post_ra>
// kernel: tpu_custom_call.1
= control target key start
LH: loop header
LB: loop body
LE: loop exit
PB: predicated region body
PF: predicated region fallthrough
CT: control target
= control target key end

     0   :  { %20 = vsyncpa [#allocation3], 0  ;;  %s4763_s0 = inlined_call_operand.hbm [shape: f32[2,8,128], index: 0, kind: input, shape index: {}]   ;;  %s4764_s1 = inlined_call_operand.hbm [shape: bf16[128,384], index: 1, kind: input, shape index: {}]   ;;  %s4765_s2 = inlined_call_operand.hbm [shape: f32[1,384], index: 2, kind: input, shape index: {}]   ;;  %s4766_s3 = inlined_call_operand.hbm [shape: bf16[128,128], index: 3, kind: input, shape index: {}]   ;;  %s4767_s4 = inlined_call_operand.hbm [shape: f32[1,128], index: 4, kind: input, shape index: {}]   ;;  %s4768_s5 = inlined_call_operand.hbm [shape: bf16[128,512], index: 5, kind: input, shape index: {}]   ;;  %s4769_s6 = inlined_call_operand.vmem [shape: f32[1,512], index: 6, kind: input, shape index: {}]   ;;  %s4770_s7 = inlined_call_operand.hbm [shape: bf16[512,256], index: 7, kind: input, shape index: {}]   ;;  %s4771_s8 = inlined_call_operand.vmem [shape: f32[1,256], index: 8, kind: input, shape index: {}]   ;;  %s4772_s9 = inlined_call_operand.vmem [shape: f32[1,128], index: 9, kind: input, shape index: {}]   ;;  %s4773_s10 = inlined_call_operand.vmem [shape: f32[1,128], index: 10, kind: input, shape index: {}]   ;;  %s4774_s11 = inlined_call_operand.vmem [shape: f32[1,128], index: 11, kind: input, shape index: {}]   ;;  %s4775_s12 = inlined_call_operand.vmem [shape: f32[1,128], index: 12, kind: input, shape index: {}]   ;;  %s4776_s13 = inlined_call_operand.hbm [shape: f32[2,8,128], index: 13, kind: output, shape index: {0}]   ;;  %s4777_s14 = inlined_call_operand.hbm [shape: f32[2,8,8,8], index: 14, kind: output, shape index: {1}]  }
   0x1   :  { %21 = vsyncpa [#allocation6], 0 }
   0x2   :  { %22 = vsyncpa [#allocation9], 0 }
   0x3   :  { %23 = vsyncpa [#allocation12], 0 }
   0x4   :  { %24 = vsyncpa [#allocation4], 0  ;;  %s43_s15 = sshll.u32 %s4764_s1, 4  ;;  %s44_s15 = int_to_ptr.hbm [resolvable:$true] %s43_s15 }
   0x5   :  { %25 = vsyncpa [#allocation16], 0  ;;  %s4199_s16 = smov [#allocation5]   ;;  %s67_s20 = sshll.u32 %s4766_s3, 4  ;;  %s68_s20 = int_to_ptr.hbm [resolvable:$true] %s67_s20 }
   0x6   :  { %s45_s17 = sshll.u32 %s4199_s16, 4  ;;  %s4200_s21 = smov 192   ;;  %s46_s17 = int_to_ptr.vmem [resolvable:$true] %s45_s17 }
   0x7   :  { %s4201_s22 = smov 12   ;;  %s4202_s23 = smov [#allocation8]  }
   0x8   :  { %51 = dma.hbm_to_vmem [thread:$0]  %s44_s15, 3072, %s46_s17, [#allocation6], %s4200_s21, %s4200_s21, %s4201_s22  }
   0x9   :  { %s69_s24 = sshll.u32 %s4202_s23, 4  ;;  %s4203_s25 = smov 64   ;;  %s70_s24 = int_to_ptr.vmem [resolvable:$true] %s69_s24 }
   0xa   :  { %s4204_s26 = smov 4   ;;  %s91_s28 = sshll.u32 %s4768_s5, 4  ;;  %s92_s28 = int_to_ptr.hbm [resolvable:$true] %s91_s28 }
   0xb   :  { %75 = dma.hbm_to_vmem [thread:$0]  %s68_s20, 1024, %s70_s24, [#allocation9], %s4203_s25, %s4203_s25, %s4204_s26  }
   0xc   :  { %s4205_s29 = smov [#allocation11]   ;;  %s30_s18 = sshll.u32 %s4763_s0, 4  ;;  %s31_s18 = int_to_ptr.hbm [resolvable:$true] %s30_s18 }
   0xd   :  { %s93_s30 = sshll.u32 %s4205_s29, 4  ;;  %s4206_s15 = smov 256   ;;  %s94_s30 = int_to_ptr.vmem [resolvable:$true] %s93_s30 }
   0xe   :  { %s4207_s17 = smov 16   ;;  %s4208_s19 = smov [#allocation2]  }
   0xf   :  { %99 = dma.hbm_to_vmem [thread:$0]  %s92_s28, 4096, %s94_s30, [#allocation12], %s4206_s15, %s4206_s15, %s4207_s17  }
  0x10   :  { %s32_s21 = sshll.u32 %s4208_s19, 4  ;;  %s4209_s20 = smov 128   ;;  %s33_s21 = int_to_ptr.vmem [resolvable:$true] %s32_s21 }
  0x11   :  { %s4210_s22 = smov 8   ;;  %s57_s24 = sshll.u32 %s4765_s2, 4  ;;  %s58_s24 = int_to_ptr.hbm [resolvable:$true] %s57_s24 }
  0x12   :  { %38 = dma.hbm_to_vmem [thread:$0]  %s31_s18, 256, %s33_s21, [#allocation3], %s4209_s20, %s4209_s20, %s4210_s22  }
  0x13   :  { %s4211_s25 = smov [#allocation7]   ;;  %s81_s27 = sshll.u32 %s4767_s4, 4  ;;  %s82_s27 = int_to_ptr.hbm [resolvable:$true] %s81_s27 }
  0x14   :  { %s59_s0 = sshll.u32 %s4211_s25, 4  ;;  %s4212_s28 = smov [#allocation10]   ;;  %s60_s0 = int_to_ptr.vmem [resolvable:$true] %s59_s0 }
  0x15   :  { %62 = dma.hbm_to_vmem [thread:$0]  %s58_s24, 48, %s60_s0, [#allocation6]  }
  0x16   :  { %s83_s29 = sshll.u32 %s4212_s28, 4  ;;  %s106_s3 = sshll.u32 %s4770_s7, 4  ;;  %s84_s29 = int_to_ptr.vmem [resolvable:$true] %s83_s29  ;;  %s107_s3 = int_to_ptr.hbm [resolvable:$true] %s106_s3 }
  0x17   :  { %86 = dma.hbm_to_vmem [thread:$0]  %s82_s27, 16, %s84_s29, [#allocation9]  }
  0x18   :  { %s4213_s2 = smov [#allocation13]  }
  0x19   :  { %s108_s18 = sshll.u32 %s4213_s2, 4  ;;  %s109_s18 = int_to_ptr.vmem [resolvable:$true] %s108_s18 }
  0x1a   :  { %114 = dma.hbm_to_vmem [thread:$0]  %s107_s3, 8192, %s109_s18, [#allocation12], %s4209_s20, %s4209_s20, %s4210_s22  }
  0x1b   :  { %4187 = dma.done.wait [#allocation3], 256  }
  0x1c   :  { %4188 = vsyncadd [#allocation3], 4294967040 }
  0x1d   :  { %4189 = dma.done.wait [#allocation6], 3120  }
  0x1e   :  { %4190 = vsyncadd [#allocation6], 4294964176 }
  0x1f   :  { %4191 = dma.done.wait [#allocation9], 1040  }
  0x20   :  { %4192 = vsyncadd [#allocation9], 4294966256 }
  0x21   :  { %4193 = dma.done.wait [#allocation12], 12288  }
  0x22   :  { %4194 = vsyncadd [#allocation12], 4294955008  ;;  %v3090_v0 = vld [vmem:[#allocation5 + $0xa8] sm:$0xf]  ;;  %v3442_v1 = vld [vmem:[#allocation5 + $0xb0] sm:$0xf0] }
  0x23   :  { %v3441_v2 = vld [vmem:[#allocation5 + $0xac] sm:$0xf]  ;;  %v3091_v3 = vor.u32 %v3442_v1, %v3090_v0  ;;  %v3092_v4 = vld [vmem:[#allocation5 + $0xb4] sm:$0xf0]  ;;  %v3078_v5 = vld [vmem:[#allocation5 + $0x90] sm:$0xf] }
  0x24   :  { %v3439_v6 = vld [vmem:[#allocation5 + $0x98] sm:$0xf0]  ;;  %v3095_v7 = vor.u32 %v3441_v2, %v3092_v4  ;;  %v3438_v8 = vld [vmem:[#allocation5 + $0x94] sm:$0xf]  ;;  %v3080_v9 = vld [vmem:[#allocation5 + $0x9c] sm:$0xf0] }
  0x25   :  { %325 = vmatpush.bf16.msra.mxu0 %v3091_v3  ;;  %v3079_v10 = vor.u32 %v3439_v6, %v3078_v5  ;;  %v3083_v11 = vor.u32 %v3438_v8, %v3080_v9  ;;  %v3066_v12 = vld [vmem:[#allocation5 + $0x78] sm:$0xf]  ;;  %v3436_v13 = vld [vmem:[#allocation5 + $0x80] sm:$0xf0]  ;;  %v3435_v14 = vld [vmem:[#allocation5 + $0x7c] sm:$0xf] }
  0x26   :  { %339 = vmatpush.bf16.msra.mxu1 %v3095_v7  ;;  %v3068_v15 = vld [vmem:[#allocation5 + $0x84] sm:$0xf0]  ;;  %v3067_v16 = vor.u32 %v3436_v13, %v3066_v12  ;;  %v3054_v18 = vld [vmem:[#allocation5 + $0x60] sm:$0xf]  ;;  %v3433_v19 = vld [vmem:[#allocation5 + $0x68] sm:$0xf0] }
  0x27   :  { %v3071_v17 = vor.u32 %v3435_v14, %v3068_v15  ;;  %v3432_v20 = vld [vmem:[#allocation5 + $0x64] sm:$0xf]  ;;  %v3056_v21 = vld [vmem:[#allocation5 + $0x6c] sm:$0xf0]  ;;  %v3055_v22 = vor.u32 %v3433_v19, %v3054_v18  ;;  %v3042_v23 = vld [vmem:[#allocation5 + $0x48] sm:$0xf] }
  0x28   :  { %v3430_v24 = vld [vmem:[#allocation5 + $0x50] sm:$0xf0]  ;;  %v3059_v25 = vor.u32 %v3432_v20, %v3056_v21  ;;  %v3429_v26 = vld [vmem:[#allocation5 + $0x4c] sm:$0xf]  ;;  %v3044_v27 = vld [vmem:[#allocation5 + $0x54] sm:$0xf0] }
  0x29   :  { %326 = vmatpush.bf16.msra.mxu0 %v3079_v10  ;;  %v3043_v28 = vor.u32 %v3430_v24, %v3042_v23  ;;  %v3047_v29 = vor.u32 %v3429_v26, %v3044_v27  ;;  %v3030_v30 = vld [vmem:[#allocation5 + $0x30] sm:$0xf]  ;;  %v3427_v31 = vld [vmem:[#allocation5 + $0x38] sm:$0xf0]  ;;  %v3426_v32 = vld [vmem:[#allocation5 + $0x34] sm:$0xf] }
  0x2a   :  { %340 = vmatpush.bf16.msra.mxu1 %v3083_v11  ;;  %v3032_v33 = vld [vmem:[#allocation5 + $0x3c] sm:$0xf0]  ;;  %v3031_v34 = vor.u32 %v3427_v31, %v3030_v30  ;;  %v3018_v36 = vld [vmem:[#allocation5 + $0x18] sm:$0xf]  ;;  %v3424_v37 = vld [vmem:[#allocation5 + $0x20] sm:$0xf0] }
  0x2b   :  { %v3035_v35 = vor.u32 %v3426_v32, %v3032_v33  ;;  %v3423_v38 = vld [vmem:[#allocation5 + $0x1c] sm:$0xf]  ;;  %v3020_v39 = vld [vmem:[#allocation5 + $0x24] sm:$0xf0]  ;;  %v3019_v40 = vor.u32 %v3424_v37, %v3018_v36  ;;  %v3006_v42 = vld [vmem:[#allocation5] sm:$0xf] }
  0x2c   :  { %v3023_v41 = vor.u32 %v3423_v38, %v3020_v39  ;;  %v3421_v43 = vld [vmem:[#allocation5 + $0x8] sm:$0xf0]  ;;  %v3420_v44 = vld [vmem:[#allocation5 + $0x4] sm:$0xf]  ;;  %v3008_v45 = vld [vmem:[#allocation5 + $0xc] sm:$0xf0] }
  0x2d   :  { %327 = vmatpush.bf16.msra.mxu0 %v3067_v16  ;;  %v3007_v46 = vor.u32 %v3421_v43, %v3006_v42  ;;  %v154_v47 = vld [vmem:[#allocation2] sm:$0xff]  ;;  %v155_v48 = vld [vmem:[#allocation2 + $0x8] sm:$0xff]  ;;  %v3011_v49 = vor.u32 %v3420_v44, %v3008_v45  ;;  %v4323_v51 = vld [vmem:[#allocation7] sm:$0x7]  ;;  %vm1125_vm0 = vcmask 130048   ;;  %vm1472_vm1 = vcmask 64512  }
  0x2e   :  { %341 = vmatpush.bf16.msra.mxu1 %v3071_v17  ;;  %v4319_v50 = vpack.c.bf16 %v155_v48, %v154_v47  ;;  %v191_v52 = vperm.slane %v4323_v51, 0  ;;  %v192_v53 = vperm.slane %v4323_v51, 1  ;;  %v3098_v15 = vld [vmem:[#allocation5 + $0xb0] sm:$0xf]  ;;  %v3443_v16 = vld [vmem:[#allocation5 + $0xb8] sm:$0xf0] }
  0x2f   :  { %v3086_v17 = vld [vmem:[#allocation5 + $0x98] sm:$0xf]  ;;  %v3099_v18 = vor.u32 %v3443_v16, %v3098_v15  ;;  %v3440_v19 = vld [vmem:[#allocation5 + $0xa0] sm:$0xf0]  ;;  %v3437_v30 = vld [vmem:[#allocation5 + $0x88] sm:$0xf0] }
  0x30   :  { %v3062_v31 = vld [vmem:[#allocation5 + $0x68] sm:$0xf]  ;;  %v3434_v33 = vld [vmem:[#allocation5 + $0x70] sm:$0xf0]  ;;  %v3050_v42 = vld [vmem:[#allocation5 + $0x50] sm:$0xf] }
  0x31   :  { %328 = vmatpush.bf16.msra.mxu0 %v3055_v22  ;;  %353 = vmatpush.bf16.msra.mxu2 %v3099_v18  ;;  %v3087_v22 = vor.u32 %v3440_v19, %v3086_v17  ;;  %v3063_v36 = vor.u32 %v3434_v33, %v3062_v31  ;;  %v3431_v43 = vld [vmem:[#allocation5 + $0x58] sm:$0xf0]  ;;  %s2983_s24 = sshll.u32 %s4777_s14, 4  ;;  %s4216_s1 = smov [#allocation14]   ;;  %s2984_s24 = int_to_ptr.hbm [resolvable:$true] %s2983_s24 }
  0x32   :  { %342 = vmatpush.bf16.msra.mxu1 %v3059_v25  ;;  %v3051_v44 = vor.u32 %v3431_v43, %v3050_v42  ;;  %s2970_s29 = sshll.u32 %s4776_s13, 4  ;;  %s2971_s29 = int_to_ptr.hbm [resolvable:$true] %s2970_s29 }
  0x35   :  { %329 = vmatpush.bf16.msra.mxu0 %v3043_v28  ;;  %354 = vmatpush.bf16.msra.mxu2 %v3087_v22 }
  0x36   :  { %343 = vmatpush.bf16.msra.mxu1 %v3047_v29  ;;  %v3074_v29 = vld [vmem:[#allocation5 + $0x80] sm:$0xf] }
  0x37   :  { %v3075_v32 = vor.u32 %v3437_v30, %v3074_v29 }
  0x39   :  { %330 = vmatpush.bf16.msra.mxu0 %v3031_v34  ;;  %355 = vmatpush.bf16.msra.mxu2 %v3075_v32 }
  0x3a   :  { %344 = vmatpush.bf16.msra.mxu1 %v3035_v35 }
  0x3d   :  { %331 = vmatpush.bf16.msra.mxu0 %v3019_v40  ;;  %356 = vmatpush.bf16.msra.mxu2 %v3063_v36 }
  0x3e   :  { %345 = vmatpush.bf16.msra.mxu1 %v3023_v41 }
  0x41   :  { %332 = vmatpush.bf16.msra.mxu0 %v3007_v46  ;;  %357 = vmatpush.bf16.msra.mxu2 %v3051_v44 }
  0x42   :  { %346 = vmatpush.bf16.msra.mxu1 %v3011_v49 }
  0x44   :  { %333 = vmatmul.bf16.vlgmr.msra.gmra.mxu0 %v4319_v50 }
  0x45   :  { %347 = vmatmul.bf16.vlgmr.msra.gmra.mxu1 %v4319_v50 }
  0xc1   :  { %v334_v54 = vpop.f32.mrf.mxu0 }
  0xc2   :  { %v335_v55 = vadd.f32 %v334_v54, %v191_v52  ;;  %v348_v56 = vpop.f32.mrf.mxu1  ;;  %v3038_v54 = vld [vmem:[#allocation5 + $0x38] sm:$0xf] }
  0xc3   :  { %v349_v57 = vadd.f32 %v348_v56, %v192_v53 }
  0xc5   :  { %v3535_v58 = vpack.i.bf16 %v349_v57, %v335_v55  ;;  %v3428_v55 = vld [vmem:[#allocation5 + $0x40] sm:$0xf0] }
  0xc7   :  { %3536 = vxpose.xlu0.b32.start.end [1/1] (short) %v3535_v58, 128  ;;  %v3039_v58 = vor.u32 %v3428_v55, %v3038_v54 }
  0xc9   :  { %v336_v59 = vpop.f32.mrf.mxu0  ;;  %358 = vmatpush.bf16.msra.mxu2 %v3039_v58 }
  0xca   :  { %v337_v60 = vadd.f32 %v336_v59, %v191_v52  ;;  %v350_v61 = vpop.f32.mrf.mxu1 }
  0xcb   :  { %v351_v62 = vadd.f32 %v350_v61, %v192_v53 }
  0xcd   :  { %v3626_v63 = vpack.i.bf16 %v351_v62, %v337_v60 }
  0xcf   :  { %3627 = vxpose.xlu2.b32.start.end [1/1] (short) %v3626_v63, 128 }
 0x168   :  { %v4327_v0 = vpop.trf.xlu2 }
 0x169   :  { %v3632_v46 = vunpack.i.h.bf16 %v4327_v0  ;;  %v3629_v48 = vunpack.i.l.bf16 %v4327_v0 }
 0x16b   :  { %v3537_v1 = vpop.trf.xlu0  ;;  %v1103_v53 = vpack.c.bf16 %v3632_v46, %v3632_v46 }
 0x16c   :  { %v3541_v2 = vunpack.i.h.bf16 %v3537_v1  ;;  %v3538_v14 = vunpack.i.l.bf16 %v3537_v1 }
 0x16d   :  { %v1298_v60 = vunpack.c.l.b16 %v1103_v53 }
 0x16e   :  { %v1087_v6 = vpack.c.bf16 %v3541_v2, %v3541_v2 }
 0x170   :  { %v4329_v3 = vpop.trf.xlu2  ;;  %v1121_v9 = vunpack.c.l.b16 %v1087_v6 }
 0x171   :  { %v3637_v45 = vunpack.i.h.bf16 %v4329_v3  ;;  %v3634_v62 = vunpack.i.l.bf16 %v4329_v3  ;;  %v3014_v3 = vld [vmem:[#allocation5 + $0x8] sm:$0xf] }
 0x173   :  { %v3542_v4 = vpop.trf.xlu0  ;;  %v1104_v52 = vpack.c.bf16 %v3637_v45, %v3637_v45 }
 0x174   :  { %v3546_v5 = vunpack.i.h.bf16 %v3542_v4  ;;  %v3543_v24 = vunpack.i.l.bf16 %v3542_v4  ;;  %v3026_v4 = vld [vmem:[#allocation5 + $0x20] sm:$0xf] }
 0x175   :  { %v1299_v59 = vunpack.c.l.b16 %v1104_v52 }
 0x176   :  { %v1088_v7 = vpack.c.bf16 %v3546_v5, %v3546_v5  ;;  %v3425_v5 = vld [vmem:[#allocation5 + $0x28] sm:$0xf0] }
 0x177   :  { %v1300_v2 = vpack.c.b16 %v1299_v59, %v1298_v60  ;;  %v3027_v6 = vor.u32 %v3425_v5, %v3026_v4 }
 0x178   :  { %v1122_v8 = vunpack.c.l.b16 %v1088_v7  ;;  %v4331_v10 = vpop.trf.xlu2 }
 0x179   :  { %1312 = vmatpush.bf16.msrb.mxu1 %v1300_v2  ;;  %359 = vmatpush.bf16.msra.mxu2 %v3027_v6 }
 0x17a   :  { %v1123_v11 = vpack.c.b16 %v1122_v8, %v1121_v9  ;;  %v3642_v8 = vunpack.i.h.bf16 %v4331_v10 }
 0x17b   :  { %v3547_v12 = vpop.trf.xlu0 }
 0x17c   :  { %1136 = vmatpush.bf16.msra.mxu3 %v1123_v11  ;;  %v3548_v13 = vunpack.i.l.bf16 %v3547_v12  ;;  %v3551_v21 = vunpack.i.h.bf16 %v3547_v12  ;;  %v1105_v18 = vpack.c.bf16 %v3642_v8, %v3642_v8 }
 0x17e   :  { %v3617_v20 = vpack.i.bf16 %v3548_v13, %v3538_v14  ;;  %v1089_v26 = vpack.c.bf16 %v3551_v21, %v3551_v21  ;;  %v3422_v14 = vld [vmem:[#allocation5 + $0x10] sm:$0xf0]  ;;  %v1320_v21 = vunpack.c.l.b16 %v1105_v18 }
 0x17f   :  { %v3015_v16 = vor.u32 %v3422_v14, %v3014_v3 }
 0x180   :  { %3618 = vxpose.xlu0.b32.start [1/2] (short) (narrow) %v3617_v20, 8  ;;  %v4333_v23 = vpop.trf.xlu2  ;;  %v1144_v38 = vunpack.c.l.b16 %v1089_v26 }
 0x181   :  { %v3647_v9 = vunpack.i.h.bf16 %v4333_v23  ;;  %360 = vmatpush.bf16.msra.mxu2 %v3015_v16  ;;  %v3644_v2 = vunpack.i.l.bf16 %v4333_v23 }
 0x183   :  { %v3552_v25 = vpop.trf.xlu0  ;;  %v1106_v20 = vpack.c.bf16 %v3647_v9, %v3647_v9 }
 0x184   :  { %v3553_v27 = vunpack.i.l.bf16 %v3552_v25  ;;  %v3556_v28 = vunpack.i.h.bf16 %v3552_v25  ;;  %361 = vmatmul.bf16.vlgmr.msra.gmra.mxu2 %v4319_v50 }
 0x185   :  { %v1321_v22 = vunpack.c.l.b16 %v1106_v20 }
 0x186   :  { %v3619_v34 = vpack.i.bf16 %v3553_v27, %v3543_v24  ;;  %v1090_v35 = vpack.c.bf16 %v3556_v28, %v3556_v28 }
 0x187   :  { %v4358_v27 = vpack.c.b16 %v1321_v22, %v1320_v21 }
 0x188   :  { %3620 = vxpose.xlu0.b32.end [2/2] (short) (narrow) %v3619_v34, 8  ;;  %v1145_v37 = vunpack.c.l.b16 %v1090_v35  ;;  %v4335_v39 = vpop.trf.xlu2 }
 0x189   :  { %v3649_v47 = vunpack.i.l.bf16 %v4335_v39  ;;  %v3652_v31 = vunpack.i.h.bf16 %v4335_v39 }
 0x18a   :  { %v1146_v40 = vpack.c.b16 %v1145_v37, %v1144_v38 }
 0x18b   :  { %v4337_v41 = vpop.trf.xlu0  ;;  %v4344_v57 = vpack.i.bf16 %v3649_v47, %v3629_v48  ;;  %v1107_v50 = vpack.c.bf16 %v3652_v31, %v3652_v31 }
 0x18c   :  { %1158 = vmatpush.bf16.msrb.mxu3 %v1146_v40  ;;  %v3561_v49 = vunpack.i.h.bf16 %v4337_v41  ;;  %v3558_v42 = vunpack.i.l.bf16 %v4337_v41 }
 0x18d   :  { %v1342_v44 = vunpack.c.l.b16 %v1107_v50 }
 0x18e   :  { %v1091_v61 = vpack.c.bf16 %v3561_v49, %v3561_v49 }
 0x190   :  { %v3653_v56 = vpop.trf.xlu2  ;;  %v1166_v12 = vunpack.c.l.b16 %v1091_v61  ;;  %v3639_v61 = vunpack.i.l.bf16 %v4331_v10 }
 0x191   :  { %v3654_v1 = vunpack.i.l.bf16 %v3653_v56  ;;  %v3657_v32 = vunpack.i.h.bf16 %v3653_v56 }
 0x193   :  { %v3562_v63 = vpop.trf.xlu0  ;;  %v4349_v11 = vpack.i.bf16 %v3654_v1, %v3634_v62  ;;  %v1108_v38 = vpack.c.bf16 %v3657_v32, %v3657_v32 }
 0x194   :  { %v3566_v0 = vunpack.i.h.bf16 %v3562_v63  ;;  %v3563_v48 = vunpack.i.l.bf16 %v3562_v63 }
 0x195   :  { %v1343_v45 = vunpack.c.l.b16 %v1108_v38 }
 0x196   :  { %v1092_v7 = vpack.c.bf16 %v3566_v0, %v3566_v0 }
 0x197   :  { %v4366_v52 = vpack.c.b16 %v1343_v45, %v1342_v44 }
 0x198   :  { %v1167_v13 = vunpack.c.l.b16 %v1092_v7  ;;  %v4351_v15 = vpop.trf.xlu2 }
 0x19a   :  { %v4353_v17 = vpack.c.b16 %v1167_v13, %v1166_v12 }
 0x19b   :  { %v3567_v19 = vpop.trf.xlu0 }
 0x19c   :  { %v3571_v24 = vunpack.i.h.bf16 %v3567_v19  ;;  %v3568_v62 = vunpack.i.l.bf16 %v3567_v19 }
 0x19e   :  { %v1093_v29 = vpack.c.bf16 %v3571_v24, %v3571_v24  ;;  %v3726_v0 = vpack.i.bf16 %v3639_v61, %v3568_v62 }
 0x1a0   :  { %v4356_v25 = vpop.trf.xlu2  ;;  %v1188_v34 = vunpack.c.l.b16 %v1093_v29 }
 0x1a1   :  { %v3664_v31 = vunpack.i.l.bf16 %v4356_v25 }
 0x1a3   :  { %v3572_v26 = vpop.trf.xlu0 }
 0x1a4   :  { %v3576_v28 = vunpack.i.h.bf16 %v3572_v26  ;;  %v3573_v4 = vunpack.i.l.bf16 %v3572_v26 }
 0x1a6   :  { %v1094_v30 = vpack.c.bf16 %v3576_v28, %v3576_v28  ;;  %v3728_v6 = vpack.i.bf16 %v3644_v2, %v3573_v4 }
 0x1a8   :  { %v1189_v33 = vunpack.c.l.b16 %v1094_v30  ;;  %v4361_v35 = vpop.trf.xlu2 }
 0x1a9   :  { %v3669_v16 = vunpack.i.l.bf16 %v4361_v35 }
 0x1aa   :  { %v1190_v36 = vpack.c.b16 %v1189_v33, %v1188_v34 }
 0x1ab   :  { %v3577_v37 = vpop.trf.xlu0 }
 0x1ac   :  { %1202 = vmatpush.bf16.msrb.mxu0 %v1190_v36  ;;  %v3578_v40 = vunpack.i.l.bf16 %v3577_v37  ;;  %v3581_v46 = vunpack.i.h.bf16 %v3577_v37 }
 0x1ae   :  { %v3708_v43 = vpack.i.bf16 %v3558_v42, %v3578_v40  ;;  %v1095_v49 = vpack.c.bf16 %v3581_v46, %v3581_v46  ;;  %v3662_v46 = vunpack.i.h.bf16 %v4351_v15 }
 0x1b0   :  { %3709 = vxpose.xlu1.b32.start [1/2] (short) (narrow) %v3708_v43, 8  ;;  %v4364_v47 = vpop.trf.xlu2  ;;  %v1210_v59 = vunpack.c.l.b16 %v1095_v49 }
 0x1b1   :  { %v3674_v21 = vunpack.i.l.bf16 %v4364_v47 }
 0x1b3   :  { %v3582_v39 = vpop.trf.xlu0 }
 0x1b4   :  { %v3583_v53 = vunpack.i.l.bf16 %v3582_v39  ;;  %v3586_v54 = vunpack.i.h.bf16 %v3582_v39  ;;  %v3667_v39 = vunpack.i.h.bf16 %v4356_v25 }
 0x1b6   :  { %v3710_v55 = vpack.i.bf16 %v3563_v48, %v3583_v53  ;;  %v1096_v56 = vpack.c.bf16 %v3586_v54, %v3586_v54  ;;  %v1109_v54 = vpack.c.bf16 %v3662_v46, %v3662_v46 }
 0x1b8   :  { %3711 = vxpose.xlu1.b32.end [2/2] (short) (narrow) %v3710_v55, 8  ;;  %v1211_v58 = vunpack.c.l.b16 %v1096_v56  ;;  %v4368_v41 = vpop.trf.xlu2  ;;  %v1110_v55 = vpack.c.bf16 %v3667_v39, %v3667_v39 }
 0x1b9   :  { %v3679_v23 = vunpack.i.l.bf16 %v4368_v41 }
 0x1ba   :  { %v1212_v60 = vpack.c.b16 %v1211_v58, %v1210_v59  ;;  %v1364_v58 = vunpack.c.l.b16 %v1109_v54  ;;  %v1365_v59 = vunpack.c.l.b16 %v1110_v55 }
 0x1bb   :  { %v3587_v1 = vpop.trf.xlu0  ;;  %v3744_v20 = vpack.i.bf16 %v3669_v16, %v3679_v23 }
 0x1bc   :  { %1224 = vmatpush.bf16.msrb.mxu2 %v1212_v60  ;;  %v3588_v7 = vunpack.i.l.bf16 %v3587_v1  ;;  %v3591_v37 = vunpack.i.h.bf16 %v3587_v1  ;;  %v1366_v62 = vpack.c.b16 %v1365_v59, %v1364_v58  ;;  %v3672_v1 = vunpack.i.h.bf16 %v4361_v35 }
 0x1be   :  { %v1097_v42 = vpack.c.bf16 %v3591_v37, %v3591_v37  ;;  %v1111_v25 = vpack.c.bf16 %v3672_v1, %v3672_v1 }
 0x1c0   :  { %3727 = vxpose.xlu1.b32.start [1/2] (short) (narrow) %v3726_v0, 8  ;;  %v4371_v63 = vpop.trf.xlu2  ;;  %v1232_v48 = vunpack.c.l.b16 %v1097_v42  ;;  %v3677_v0 = vunpack.i.h.bf16 %v4364_v47 }
 0x1c2   :  { %v1112_v4 = vpack.c.bf16 %v3677_v0, %v3677_v0 }
 0x1c3   :  { %v3592_v5 = vpop.trf.xlu0 }
 0x1c4   :  { %v3593_v10 = vunpack.i.l.bf16 %v3592_v5  ;;  %v3596_v38 = vunpack.i.h.bf16 %v3592_v5 }
 0x1c6   :  { %v1098_v43 = vpack.c.bf16 %v3596_v38, %v3596_v38 }
 0x1c8   :  { %3729 = vxpose.xlu1.b32.end [2/2] (short) (narrow) %v3728_v6, 8  ;;  %v4378_v18 = vpop.trf.xlu2  ;;  %v1233_v49 = vunpack.c.l.b16 %v1098_v43 }
 0x1c9   :  { %v3689_v50 = vunpack.i.l.bf16 %v4378_v18 }
 0x1ca   :  { %v1234_v56 = vpack.c.b16 %v1233_v49, %v1232_v48 }
 0x1cb   :  { %v3597_v8 = vpop.trf.xlu0 }
 0x1cc   :  { %v3598_v9 = vunpack.i.l.bf16 %v3597_v8  ;;  %1246 = vmatpush.bf16.msra.mxu2 %v1234_v56  ;;  %v3601_v60 = vunpack.i.h.bf16 %v3597_v8  ;;  %v3687_v8 = vunpack.i.h.bf16 %v4371_v63 }
 0x1ce   :  { %v3717_v12 = vpack.i.bf16 %v3598_v9, %v3588_v7  ;;  %v1386_v7 = vunpack.c.l.b16 %v1111_v25  ;;  %v1387_v9 = vunpack.c.l.b16 %v1112_v4  ;;  %v1114_v35 = vpack.c.bf16 %v3687_v8, %v3687_v8 }
 0x1d0   :  { %3718 = vxpose.xlu2.b32.start [1/2] (short) (narrow) %v3717_v12, 8  ;;  %3736 = vxpose.xlu1.b32.start [1/2] (short) (narrow) %v4344_v57, 8  ;;  %v3684_v57 = vunpack.i.l.bf16 %v4371_v63  ;;  %v4384_v22 = vpop.trf.xlu2 }
 0x1d1   :  { %v3694_v44 = vunpack.i.l.bf16 %v4384_v22 }
 0x1d2   :  { %v3746_v26 = vpack.i.bf16 %v3674_v21, %v3684_v57 }
 0x1d3   :  { %v3602_v13 = vpop.trf.xlu0 }
 0x1d4   :  { %v3603_v3 = vunpack.i.l.bf16 %v3602_v13  ;;  %v3606_v61 = vunpack.i.h.bf16 %v3602_v13 }
 0x1d6   :  { %v3719_v14 = vpack.i.bf16 %v3603_v3, %v3593_v10  ;;  %v1100_v2 = vpack.c.bf16 %v3606_v61, %v3606_v61  ;;  %v1388_v10 = vpack.c.b16 %v1387_v9, %v1386_v7  ;;  %v3682_v3 = vunpack.i.h.bf16 %v4368_v41 }
 0x1d8   :  { %3720 = vxpose.xlu2.b32.end [2/2] (short) (narrow) %v3719_v14, 8  ;;  %3738 = vxpose.xlu1.b32.end [2/2] (short) (narrow) %v4349_v11, 8  ;;  %v3659_v11 = vunpack.i.l.bf16 %v4351_v15  ;;  %v4390_v29 = vpop.trf.xlu2  ;;  %v1099_v15 = vpack.c.bf16 %v3601_v60, %v3601_v60  ;;  %v1255_v6 = vunpack.c.l.b16 %v1100_v2  ;;  %v1113_v13 = vpack.c.bf16 %v3682_v3, %v3682_v3 }
 0x1d9   :  { %v3699_v36 = vunpack.i.l.bf16 %v4390_v29  ;;  %1400 = vmatpush.bf16.msra.mxu1 %v1388_v10 }
 0x1da   :  { %v1254_v5 = vunpack.c.l.b16 %v1099_v15  ;;  %v1408_v16 = vunpack.c.l.b16 %v1113_v13  ;;  %v3702_v15 = vunpack.i.h.bf16 %v4390_v29  ;;  %v193_v13 = vperm.slane %v4323_v51, 2 }
 0x1db   :  { %v4380_v19 = vpop.trf.xlu0  ;;  %v3762_v40 = vpack.i.bf16 %v3699_v36, %v3689_v50 }
 0x1dc   :  { %v3608_v28 = vunpack.i.l.bf16 %v4380_v19  ;;  %v1256_v12 = vpack.c.b16 %v1255_v6, %v1254_v5  ;;  %v3611_v57 = vunpack.i.h.bf16 %v4380_v19  ;;  %v1117_v25 = vpack.c.bf16 %v3702_v15, %v3702_v15 }
 0x1de   :  { %v3753_v30 = vpack.i.bf16 %v3659_v11, %v3608_v28  ;;  %v1101_v11 = vpack.c.bf16 %v3611_v57, %v3611_v57  ;;  %v1452_v5 = vunpack.c.l.b16 %v1117_v25 }
 0x1e0   :  { %3745 = vxpose.xlu1.b32.start [1/2] (short) (narrow) %v3744_v20, 8  ;;  %v4394_v33 = vpop.trf.xlu2  ;;  %v1409_v20 = vunpack.c.l.b16 %v1114_v35 }
 0x1e1   :  { %v3704_v45 = vunpack.i.l.bf16 %v4394_v33  ;;  %v3707_v2 = vunpack.i.h.bf16 %v4394_v33 }
 0x1e2   :  { %v1410_v21 = vpack.c.b16 %v1409_v20, %v1408_v16 }
 0x1e3   :  { %v4386_v24 = vpop.trf.xlu0  ;;  %v3764_v53 = vpack.i.bf16 %v3704_v45, %v3694_v44  ;;  %v1118_v4 = vpack.c.bf16 %v3707_v2, %v3707_v2 }
 0x1e4   :  { %v3613_v32 = vunpack.i.l.bf16 %v4386_v24 }
 0x1e5   :  { %v1453_v6 = vunpack.c.l.b16 %v1118_v4 }
 0x1e6   :  { %v3755_v34 = vpack.i.bf16 %v3664_v31, %v3613_v32 }
 0x1e7   :  { %v1454_v10 = vpack.c.b16 %v1453_v6, %v1452_v5 }
 0x1e8   :  { %3747 = vxpose.xlu1.b32.end [2/2] (short) (narrow) %v3746_v26, 8  ;;  %v3616_v26 = vunpack.i.h.bf16 %v4386_v24 }
 0x1ea   :  { %v1102_v63 = vpack.c.bf16 %v3616_v26, %v3616_v26 }
 0x1ec   :  { %v1277_v31 = vunpack.c.l.b16 %v1102_v63 }
 0x1f0   :  { %3754 = vxpose.xlu1.b32.start [1/2] (short) (narrow) %v3753_v30, 8  ;;  %v1276_v30 = vunpack.c.l.b16 %v1101_v11 }
 0x1f2   :  { %v1278_v32 = vpack.c.b16 %v1277_v31, %v1276_v30 }
 0x1f4   :  { %1290 = vmatpush.bf16.msra.mxu0 %v1278_v32 }
 0x1f8   :  { %3756 = vxpose.xlu1.b32.end [2/2] (short) (narrow) %v3755_v34, 8  ;;  %v3692_v34 = vunpack.i.h.bf16 %v4378_v18 }
 0x1fa   :  { %v1115_v36 = vpack.c.bf16 %v3692_v34, %v3692_v34 }
 0x1fc   :  { %v1430_v19 = vunpack.c.l.b16 %v1115_v36 }
 0x200   :  { %3763 = vxpose.xlu1.b32.start [1/2] (short) (narrow) %v3762_v40, 8 }
 0x207   :  { %v362_v3 = vpop.f32.mrf.mxu2 }
 0x208   :  { %3765 = vxpose.xlu1.b32.end [2/2] (short) (narrow) %v3764_v53, 8  ;;  %v4429_v35 = vadd.f32 %v362_v3, %v193_v13 }
 0x224   :  { %v3621_v14 = vpop.trf.xlu0 }
 0x225   :  { %v3622_v23 = vunpack.i.l.bf16 %v3621_v14  ;;  %v3625_v41 = vunpack.i.h.bf16 %v3621_v14 }
 0x227   :  { %v1071_v47 = vpack.c.bf16 %v3622_v23, %v3622_v23  ;;  %v1072_v28 = vpack.c.bf16 %v3625_v41, %v3625_v41  ;;  %v364_v23 = vpop.f32.mrf.mxu2 }
 0x228   :  { %v4431_v16 = vadd.f32 %v364_v23, %v193_v13 }
 0x229   :  { %3100 = vmatmul.msk.bf16.vlgmr.msra.gmra.mxu3 %vm1125_vm0, %v1071_v47 }
 0x22a   :  { %1180 = vmatpush.bf16.msra.mxu3 %v4353_v17  ;;  %v3697_v17 = vunpack.i.h.bf16 %v4384_v22  ;;  %v3771_v20 = vpack.i.bf16 %v4431_v16, %v4429_v35 }
 0x22c   :  { %v1116_v50 = vpack.c.bf16 %v3697_v17, %v3697_v17 }
 0x22e   :  { %v1431_v37 = vunpack.c.l.b16 %v1116_v50 }
 0x230   :  { %v1432_v44 = vpack.c.b16 %v1431_v37, %v1430_v19 }
 0x239   :  { %3101 = vmatmul.msk.bf16.vlgmr.msrb.gmra.mxu3 %vm1125_vm0, %v1072_v28 }
 0x23a   :  { %1268 = vmatpush.bf16.msrb.mxu3 %v1256_v12 }
 0x254   :  { %v3712_v24 = vpop.trf.xlu1 }
 0x255   :  { %v3716_v38 = vunpack.i.h.bf16 %v3712_v24  ;;  %v3713_v40 = vunpack.i.l.bf16 %v3712_v24 }
 0x257   :  { %v1073_v42 = vpack.c.bf16 %v3716_v38, %v3716_v38  ;;  %v1075_v43 = vpack.c.bf16 %v3713_v40, %v3713_v40 }
 0x259   :  { %3102 = vmatmul.msk.bf16.vlgmr.msra.gmra.mxu3 %vm1125_vm0, %v1073_v42  ;;  %3104 = vmatmul.msk.bf16.vlgmr.msrb.gmra.mxu2 %vm1125_vm0, %v1075_v43 }
 0x25a   :  { %1334 = vmatpush.bf16.msrb.mxu2 %v4358_v27  ;;  %1356 = vmatpush.bf16.msra.mxu3 %v4366_v52 }
 0x264   :  { %v3730_v18 = vpop.trf.xlu1 }
 0x265   :  { %v3731_v22 = vunpack.i.l.bf16 %v3730_v18  ;;  %v3734_v55 = vunpack.i.h.bf16 %v3730_v18 }
 0x267   :  { %v1074_v45 = vpack.c.bf16 %v3731_v22, %v3731_v22  ;;  %v1080_v58 = vpack.c.bf16 %v3734_v55, %v3734_v55 }
 0x269   :  { %v3721_v46 = vpop.trf.xlu2  ;;  %3103 = vmatmul.msk.bf16.vlgmr.msrb.gmra.mxu0 %vm1125_vm0, %v1074_v45 }
 0x26a   :  { %v3725_v39 = vunpack.i.h.bf16 %v3721_v46  ;;  %v3722_v48 = vunpack.i.l.bf16 %v3721_v46  ;;  %1378 = vmatpush.bf16.msrb.mxu0 %v1366_v62 }
 0x26c   :  { %v1077_v49 = vpack.c.bf16 %v3725_v39, %v3725_v39  ;;  %v1076_v53 = vpack.c.bf16 %v3722_v48, %v3722_v48 }
 0x26e   :  { %3105 = vmatmul.msk.bf16.vlgmr.msra.gmra.mxu2 %vm1125_vm0, %v1076_v53  ;;  %3106 = vmatmul.msk.bf16.vlgmr.msrb.gmra.mxu3 %vm1125_vm0, %v1077_v49 }
 0x26f   :  { %1422 = vmatpush.bf16.msra.mxu2 %v1410_v21  ;;  %1444 = vmatpush.bf16.msrb.mxu3 %v1432_v44 }
 0x274   :  { %v3739_v27 = vpop.trf.xlu1 }
 0x275   :  { %v3740_v54 = vunpack.i.l.bf16 %v3739_v27  ;;  %v3743_v56 = vunpack.i.h.bf16 %v3739_v27 }
 0x277   :  { %v1079_v52 = vpack.c.bf16 %v3740_v54, %v3740_v54  ;;  %v1081_v59 = vpack.c.bf16 %v3743_v56, %v3743_v56 }
 0x279   :  { %3108 = vmatmul.msk.bf16.vlgmr.msrb.gmra.mxu1 %vm1125_vm0, %v1079_v52 }
 0x27e   :  { %3109 = vmatmul.msk.bf16.vlgmr.msrb.gmra.mxu2 %vm1125_vm0, %v1080_v58  ;;  %3110 = vmatmul.msk.bf16.vlgmr.msra.gmra.mxu3 %vm1125_vm0, %v1081_v59 }
 0x284   :  { %v3748_v60 = vpop.trf.xlu1 }
 0x285   :  { %v3752_v61 = vunpack.i.h.bf16 %v3748_v60  ;;  %v3749_v62 = vunpack.i.l.bf16 %v3748_v60 }
 0x287   :  { %v1083_v1 = vpack.c.bf16 %v3752_v61, %v3752_v61  ;;  %v1084_v0 = vpack.c.bf16 %v3749_v62, %v3749_v62 }
 0x289   :  { %3112 = vmatmul.msk.bf16.vlgmr.msra.gmra.mxu1 %vm1125_vm0, %v1083_v1 }
 0x28e   :  { %3113 = vmatmul.msk.bf16.vlgmr.msra.gmra.mxu2 %vm1125_vm0, %v1084_v0 }
 0x294   :  { %v3757_v7 = vpop.trf.xlu1 }
 0x295   :  { %v3758_v9 = vunpack.i.l.bf16 %v3757_v7  ;;  %v3761_v8 = vunpack.i.h.bf16 %v3757_v7 }
 0x297   :  { %v1078_v12 = vpack.c.bf16 %v3758_v9, %v3758_v9  ;;  %v1082_v29 = vpack.c.bf16 %v3761_v8, %v3761_v8 }
 0x299   :  { %3107 = vmatmul.msk.bf16.vlgmr.msra.gmra.mxu0 %vm1125_vm0, %v1078_v12 }
 0x29a   :  { %1466 = vmatpush.bf16.msra.mxu0 %v1454_v10 }
 0x2a4   :  { %v3766_v14 = vpop.trf.xlu1 }
 0x2a5   :  { %v3767_v33 = vunpack.i.l.bf16 %v3766_v14  ;;  %v3770_v57 = vunpack.i.h.bf16 %v3766_v14 }
 0x2a7   :  { %v1085_v47 = vpack.c.bf16 %v3767_v33, %v3767_v33  ;;  %v1086_v41 = vpack.c.bf16 %v3770_v57, %v3770_v57 }
 0x2a9   :  { %3111 = vmatmul.msk.bf16.vlgmr.msrb.gmra.mxu0 %vm1125_vm0, %v1082_v29  ;;  %3114 = vmatmul.msk.bf16.vlgmr.msrb.gmra.mxu3 %vm1125_vm0, %v1085_v47 }
 0x2ac   :  { %v1138_v21 = vpop.f32.mrf.mxu3 }
 0x2ad   :  { %v1473_v51 = vsel %vm1472_vm1, %v1138_v21, -inf }
 0x2ae   :  { %1474 = vmax.xlane.f32.xlu1 %v1473_v51 }
 0x2b4   :  { %v1140_v26 = vpop.f32.mrf.mxu3 }
 0x2b9   :  { %3115 = vmatmul.msk.bf16.vlgmr.msra.gmra.mxu0 %vm1125_vm0, %v1086_v41 }
 0x2bc   :  { %v1160_v11 = vpop.f32.mrf.mxu3 }
 0x2bd   :  { %v1476_v63 = vsel %vm1472_vm1, %v1160_v11, -inf }
 0x2be   :  { %1477 = vmax.xlane.f32.xlu0 %v1476_v63 }
 0x2c4   :  { %v1162_v28 = vpop.f32.mrf.mxu3 }
 0x2dc   :  { %v4440_v30 = vpop.f32.mrf.mxu3  ;;  %v4442_v31 = vpop.f32.mrf.mxu2 }
 0x2dd   :  { %v1479_v32 = vsel %vm1472_vm1, %v4440_v30, -inf  ;;  %v1485_v45 = vsel %vm1472_vm1, %v4442_v31, -inf }
 0x2de   :  { %1480 = vmax.xlane.f32.xlu2 %v1479_v32 }
 0x2e4   :  { %v1184_v34 = vpop.f32.mrf.mxu3  ;;  %v1228_v17 = vpop.f32.mrf.mxu2 }
 0x2e6   :  { %v4446_v36 = vpop.f32.mrf.mxu0 }
 0x2e7   :  { %v1482_v44 = vsel %vm1472_vm1, %v4446_v36, -inf }
 0x2ee   :  { %v1206_v50 = vpop.f32.mrf.mxu0 }
 0x2f1   :  { %v4448_v19 = vpop.f32.mrf.mxu2  ;;  %v4450_v37 = vpop.f32.mrf.mxu3 }
 0x2f2   :  { %v1488_v48 = vsel %vm1472_vm1, %v4448_v19, -inf  ;;  %v1491_v27 = vsel %vm1472_vm1, %v4450_v37, -inf }
 0x2f6   :  { %v4452_v24 = vpop.f32.mrf.mxu1 }
 0x2f7   :  { %v1497_v38 = vsel %vm1472_vm1, %v4452_v24, -inf }
 0x2f8   :  { %1498 = vmax.xlane.f32.xlu1 %v1497_v38 }
 0x2f9   :  { %v1250_v40 = vpop.f32.mrf.mxu2  ;;  %v1272_v42 = vpop.f32.mrf.mxu3 }
 0x2fe   :  { %v1316_v43 = vpop.f32.mrf.mxu1 }
 0x300   :  { %1483 = vmax.xlane.f32.xlu1 %v1482_v44 }
 0x301   :  { %v4458_v18 = vpop.f32.mrf.mxu2  ;;  %v4460_v22 = vpop.f32.mrf.mxu3 }
 0x302   :  { %v1500_v59 = vsel %vm1472_vm1, %v4458_v18, -inf  ;;  %v1503_v5 = vsel %vm1472_vm1, %v4460_v22, -inf }
 0x306   :  { %v4474_v52 = vpop.f32.mrf.mxu1 }
 0x307   :  { %v1509_v10 = vsel %vm1472_vm1, %v4474_v52, -inf }
 0x308   :  { %1486 = vmax.xlane.f32.xlu1 %v1485_v45 }
 0x309   :  { %v1338_v46 = vpop.f32.mrf.mxu2  ;;  %v1360_v39 = vpop.f32.mrf.mxu3 }
 0x30e   :  { %v1404_v58 = vpop.f32.mrf.mxu1 }
 0x310   :  { %1489 = vmax.xlane.f32.xlu1 %v1488_v48 }
 0x311   :  { %v4466_v49 = vpop.f32.mrf.mxu2 }
 0x312   :  { %v1512_v53 = vsel %vm1472_vm1, %v4466_v49, -inf }
 0x313   :  { %1513 = vmax.xlane.f32.xlu0 %v1512_v53 }
 0x316   :  { %v4472_v54 = vpop.f32.mrf.mxu0 }
 0x317   :  { %v1494_v1 = vsel %vm1472_vm1, %v4472_v54, -inf }
 0x318   :  { %1492 = vmax.xlane.f32.xlu1 %v1491_v27 }
 0x319   :  { %v1426_v55 = vpop.f32.mrf.mxu2 }
 0x31e   :  { %v1294_v56 = vpop.f32.mrf.mxu0 }
 0x320   :  { %1501 = vmax.xlane.f32.xlu1 %v1500_v59 }
 0x321   :  { %v1475_v60 = vpop.xlane.xlu1 %1474 }
 0x322   :  { %v1521_v61 = vsub.f32 %v1138_v21, %v1475_v60 }
 0x324   :  { %v1537_v62 = vmul.f32 1.442695, %v1521_v61 }
 0x326   :  { %3895 = vpow2.f32 %v1537_v62  ;;  %v4480_v0 = vpop.f32.mrf.mxu0 }
 0x327   :  { %v1506_v13 = vsel %vm1472_vm1, %v4480_v0, -inf }
 0x328   :  { %1495 = vmax.xlane.f32.xlu1 %v1494_v1 }
 0x32c   :  { %v4482_v15 = vpop.eup %3895  ;;  %v4484_v2 = vpop.f32.mrf.mxu3 }
 0x32d   :  { %v1569_v25 = vsel %vm1472_vm1, %v4482_v15, 0.0  ;;  %v1515_v29 = vsel %vm1472_vm1, %v4484_v2, -inf }
 0x32e   :  { %1570 = vadd.xlane.f32.xlu0 %v1569_v25  ;;  %v1382_v4 = vpop.f32.mrf.mxu0 }
 0x330   :  { %1504 = vmax.xlane.f32.xlu1 %v1503_v5 }
 0x331   :  { %v1478_v6 = vpop.xlane.xlu0 %1477 }
 0x332   :  { %v1522_v7 = vsub.f32 %v1160_v11, %v1478_v6 }
 0x334   :  { %v1539_v9 = vmul.f32 1.442695, %v1522_v7  ;;  %v1448_v12 = vpop.f32.mrf.mxu3 }
 0x336   :  { %3897 = vpow2.f32 %v1539_v9  ;;  %v4506_v11 = vpop.f32.mrf.mxu0 }
 0x337   :  { %v1518_v27 = vsel %vm1472_vm1, %v4506_v11, -inf }
 0x338   :  { %1510 = vmax.xlane.f32.xlu1 %v1509_v10 }
 0x33c   :  { %v4492_v3 = vpop.eup %3897 }
 0x33d   :  { %v1572_v8 = vsel %vm1472_vm1, %v4492_v3, 0.0 }
 0x33e   :  { %1573 = vadd.xlane.f32.xlu2 %v1572_v8  ;;  %v1470_v17 = vpop.f32.mrf.mxu0 }
 0x340   :  { %1507 = vmax.xlane.f32.xlu1 %v1506_v13 }
 0x348   :  { %1516 = vmax.xlane.f32.xlu1 %v1515_v29 }
 0x351   :  { %v1481_v14 = vpop.xlane.xlu2 %1480 }
 0x352   :  { %v1523_v33 = vsub.f32 %v4440_v30, %v1481_v14 }
 0x354   :  { %v1541_v23 = vmul.f32 1.442695, %v1523_v33 }
 0x356   :  { %3899 = vpow2.f32 %v1541_v23 }
 0x35c   :  { %v4501_v47 = vpop.eup %3899 }
 0x35d   :  { %v1575_v21 = vsel %vm1472_vm1, %v4501_v47, 0.0 }
 0x35e   :  { %1576 = vadd.xlane.f32.xlu2 %v1575_v21 }
 0x36b   :  { %v1499_v51 = vpop.xlane.xlu1 %1498 }
 0x36c   :  { %v1529_v45 = vsub.f32 %v4452_v24, %v1499_v51 }
 0x373   :  { %v1484_v57 = vpop.xlane.xlu1 %1483 }
 0x374   :  { %v1524_v26 = vsub.f32 %v4446_v36, %v1484_v57 }
 0x376   :  { %v1543_v41 = vmul.f32 1.442695, %v1524_v26 }
 0x378   :  { %3901 = vpow2.f32 %v1543_v41 }
 0x37b   :  { %v1487_v63 = vpop.xlane.xlu1 %1486 }
 0x37c   :  { %v1525_v28 = vsub.f32 %v4442_v31, %v1487_v63 }
 0x37e   :  { %v4509_v30 = vpop.eup %3901  ;;  %v1545_v32 = vmul.f32 1.442695, %v1525_v28 }
 0x37f   :  { %v1578_v34 = vsel %vm1472_vm1, %v4509_v30, 0.0 }
 0x380   :  { %3903 = vpow2.f32 %v1545_v32  ;;  %1579 = vadd.xlane.f32.xlu1 %v1578_v34 }
 0x383   :  { %v1490_v50 = vpop.xlane.xlu1 %1489 }
 0x384   :  { %v1526_v38 = vsub.f32 %v4448_v19, %v1490_v50  ;;  %v1553_v19 = vmul.f32 1.442695, %v1529_v45 }
 0x386   :  { %v4514_v36 = vpop.eup %3903  ;;  %v1547_v40 = vmul.f32 1.442695, %v1526_v38  ;;  %v1514_v56 = vpop.xlane.xlu0 %1513 }
 0x387   :  { %v1581_v42 = vsel %vm1472_vm1, %v4514_v36, 0.0  ;;  %v1534_v51 = vsub.f32 %v4466_v49, %v1514_v56 }
 0x388   :  { %3905 = vpow2.f32 %v1547_v40  ;;  %1582 = vadd.xlane.f32.xlu0 %v1581_v42 }
 0x389   :  { %v1563_v35 = vmul.f32 1.442695, %v1534_v51 }
 0x38b   :  { %v1493_v31 = vpop.xlane.xlu1 %1492 }
 0x38c   :  { %v1527_v43 = vsub.f32 %v4450_v37, %v1493_v31 }
 0x38e   :  { %v4519_v44 = vpop.eup %3905  ;;  %v1549_v46 = vmul.f32 1.442695, %v1527_v43 }
 0x38f   :  { %v1584_v39 = vsel %vm1472_vm1, %v4519_v44, 0.0 }
 0x390   :  { %3907 = vpow2.f32 %v1549_v46  ;;  %1585 = vadd.xlane.f32.xlu2 %v1584_v39 }
 0x391   :  { %3909 = vpow2.f32 %v1553_v19 }
 0x393   :  { %v1502_v48 = vpop.xlane.xlu1 %1501 }
 0x394   :  { %v1530_v53 = vsub.f32 %v4458_v18, %v1502_v48 }
 0x396   :  { %v4527_v55 = vpop.eup %3907  ;;  %v1555_v37 = vmul.f32 1.442695, %v1530_v53 }
 0x397   :  { %v1587_v24 = vsel %vm1472_vm1, %v4527_v55, 0.0  ;;  %v4531_v59 = vpop.eup %3909 }
 0x398   :  { %3911 = vpow2.f32 %v1555_v37  ;;  %1519 = vmax.xlane.f32.xlu2 %v1518_v27  ;;  %1588 = vadd.xlane.f32.xlu1 %v1587_v24  ;;  %v1593_v62 = vsel %vm1472_vm1, %v4531_v59, 0.0 }
 0x39b   :  { %v1496_v58 = vpop.xlane.xlu1 %1495 }
 0x39c   :  { %v1528_v60 = vsub.f32 %v4472_v54, %v1496_v58 }
 0x39e   :  { %v4534_v18 = vpop.eup %3911  ;;  %v1551_v61 = vmul.f32 1.442695, %v1528_v60 }
 0x39f   :  { %v1596_v1 = vsel %vm1472_vm1, %v4534_v18, 0.0 }
 0x3a0   :  { %3913 = vpow2.f32 %v1551_v61  ;;  %1594 = vadd.xlane.f32.xlu2 %v1593_v62  ;;  %1597 = vadd.xlane.f32.xlu1 %v1596_v1 }
 0x3a1   :  { %v1571_v25 = vpop.xlane.xlu0 %1570 }
 0x3a2   :  { %3915 = vrcp.f32 %v1571_v25 }
 0x3a3   :  { %v1505_v4 = vpop.xlane.xlu1 %1504 }
 0x3a4   :  { %v1531_v5 = vsub.f32 %v4460_v22, %v1505_v4 }
 0x3a6   :  { %v4541_v6 = vpop.eup %3913  ;;  %v1557_v54 = vmul.f32 1.442695, %v1531_v5 }
 0x3a7   :  { %v1590_v7 = vsel %vm1472_vm1, %v4541_v6, 0.0 }
 0x3a8   :  { %v3916_v9 = vpop.eup %3915  ;;  %3917 = vpow2.f32 %v1557_v54  ;;  %1591 = vadd.xlane.f32.xlu2 %v1590_v7 }
 0x3a9   :  { %v1633_v12 = vmul.f32 %v3916_v9, %v4482_v15 }
 0x3ab   :  { %v1511_v10 = vpop.xlane.xlu1 %1510  ;;  %1649 = vst.msk [vmem:[#allocation15] sm:$0xff] %vm1472_vm1, %v1633_v12  ;;  %v1665_v8 = vpack.c.bf16 %v1633_v12, %v1633_v12 }
 0x3ac   :  { %v1533_v13 = vsub.f32 %v4474_v52, %v1511_v10 }
 0x3ad   :  { %v1722_v29 = vsel %vm1472_vm1, %v1665_v8, 0 }
 0x3ae   :  { %v4549_v22 = vpop.eup %3917  ;;  %v1561_v14 = vmul.f32 1.442695, %v1533_v13  ;;  %1731 = vmatpush.bf16.xpose.msrb.mxu1 %v1722_v29 }
 0x3af   :  { %v1599_v33 = vsel %vm1472_vm1, %v4549_v22, 0.0 }
 0x3b0   :  { %3919 = vpow2.f32 %v1561_v14  ;;  %1600 = vadd.xlane.f32.xlu1 %v1599_v33 }
 0x3b1   :  { %3772 = vxpose.xlu0.b32.start.end [1/1] (short) %v3771_v20, 128  ;;  %v1574_v15 = vpop.xlane.xlu2 %1573 }
 0x3b2   :  { %3921 = vrcp.f32 %v1574_v15 }
 0x3b3   :  { %v1508_v23 = vpop.xlane.xlu1 %1507 }
 0x3b4   :  { %v1532_v52 = vsub.f32 %v4480_v0, %v1508_v23 }
 0x3b6   :  { %v4557_v21 = vpop.eup %3919  ;;  %v1559_v57 = vmul.f32 1.442695, %v1532_v52 }
 0x3b7   :  { %v1605_v26 = vsel %vm1472_vm1, %v4557_v21, 0.0 }
 0x3b8   :  { %v3922_v41 = vpop.eup %3921  ;;  %3923 = vpow2.f32 %v1559_v57  ;;  %1606 = vadd.xlane.f32.xlu1 %v1605_v26 }
 0x3b9   :  { %v1634_v63 = vmul.f32 %v3922_v41, %v4492_v3  ;;  %3925 = vpow2.f32 %v1563_v35 }
 0x3bb   :  { %v1517_v16 = vpop.xlane.xlu1 %1516  ;;  %1650 = vst.msk [vmem:[#allocation15 + $0x8] sm:$0xff] %vm1472_vm1, %v1634_v63  ;;  %v1666_v20 = vpack.c.bf16 %v1634_v63, %v1634_v63 }
 0x3bc   :  { %v1535_v0 = vsub.f32 %v4484_v2, %v1517_v16 }
 0x3bd   :  { %v1747_v28 = vsel %vm1472_vm1, %v1666_v20, 0 }
 0x3be   :  { %v4566_v32 = vpop.eup %3923  ;;  %v1565_v49 = vmul.f32 1.442695, %v1535_v0  ;;  %1756 = vmatpush.bf16.xpose.msrb.mxu2 %v1747_v28 }
 0x3bf   :  { %v1602_v34 = vsel %vm1472_vm1, %v4566_v32, 0.0  ;;  %v4570_v3 = vpop.eup %3925 }
 0x3c0   :  { %3927 = vpow2.f32 %v1565_v49  ;;  %1603 = vadd.xlane.f32.xlu2 %v1602_v34  ;;  %v1608_v50 = vsel %vm1472_vm1, %v4570_v3, 0.0 }
 0x3c6   :  { %v4572_v17 = vpop.eup %3927 }
 0x3c7   :  { %v1611_v2 = vsel %vm1472_vm1, %v4572_v17, 0.0 }
 0x3c8   :  { %1609 = vadd.xlane.f32.xlu2 %v1608_v50  ;;  %1612 = vadd.xlane.f32.xlu1 %v1611_v2 }
 0x3d1   :  { %v1577_v38 = vpop.xlane.xlu2 %1576 }
 0x3d2   :  { %3929 = vrcp.f32 %v1577_v38 }
 0x3d8   :  { %v3930_v40 = vpop.eup %3929 }
 0x3d9   :  { %v1635_v42 = vmul.f32 %v3930_v40, %v4501_v47 }
 0x3db   :  { %1651 = vst.msk [vmem:[#allocation15 + $0x10] sm:$0xff] %vm1472_vm1, %v1635_v42  ;;  %v1667_v31 = vpack.c.bf16 %v1635_v42, %v1635_v42 }
 0x3dd   :  { %v1772_v43 = vsel %vm1472_vm1, %v1667_v31, 0 }
 0x3de   :  { %1781 = vmatpush.bf16.xpose.msra.mxu3 %v1772_v43 }
 0x3f3   :  { %v1580_v45 = vpop.xlane.xlu1 %1579 }
 0x3f4   :  { %3931 = vrcp.f32 %v1580_v45 }
 0x3fa   :  { %v3932_v46 = vpop.eup %3931 }
 0x3fb   :  { %v1583_v39 = vpop.xlane.xlu0 %1582  ;;  %v1636_v19 = vmul.f32 %v3932_v46, %v4509_v30 }
 0x3fc   :  { %3933 = vrcp.f32 %v1583_v39 }
 0x3fd   :  { %1652 = vst.msk [vmem:[#allocation15 + $0x18] sm:$0xff] %vm1472_vm1, %v1636_v19  ;;  %v1668_v48 = vpack.c.bf16 %v1636_v19, %v1636_v19 }
 0x3ff   :  { %v1797_v53 = vsel %vm1472_vm1, %v1668_v48, 0 }
 0x400   :  { %1806 = vmatpush.bf16.xpose.msrb.mxu0 %v1797_v53 }
 0x402   :  { %v3934_v47 = vpop.eup %3933 }
 0x403   :  { %v1586_v27 = vpop.xlane.xlu2 %1585  ;;  %v1637_v37 = vmul.f32 %v3934_v47, %v4514_v36 }
 0x404   :  { %3935 = vrcp.f32 %v1586_v27 }
 0x405   :  { %1653 = vst.msk [vmem:[#allocation15 + $0x20] sm:$0xff] %vm1472_vm1, %v1637_v37  ;;  %v1669_v24 = vpack.c.bf16 %v1637_v37, %v1637_v37 }
 0x407   :  { %v1822_v56 = vsel %vm1472_vm1, %v1669_v24, 0 }
 0x408   :  { %1831 = vmatpush.bf16.xpose.msra.mxu1 %v1822_v56 }
 0x40a   :  { %v3936_v58 = vpop.eup %3935 }
 0x40b   :  { %v1520_v30 = vpop.xlane.xlu2 %1519  ;;  %v1589_v60 = vpop.xlane.xlu1 %1588  ;;  %v1638_v61 = vmul.f32 %v3936_v58, %v4519_v44 }
 0x40c   :  { %v1536_v62 = vsub.f32 %v4506_v11, %v1520_v30  ;;  %3937 = vrcp.f32 %v1589_v60 }
 0x40d   :  { %1654 = vst.msk [vmem:[#allocation15 + $0x28] sm:$0xff] %vm1472_vm1, %v1638_v61  ;;  %v1670_v1 = vpack.c.bf16 %v1638_v61, %v1638_v61 }
 0x40e   :  { %v1567_v25 = vmul.f32 1.442695, %v1536_v62 }
 0x40f   :  { %v1847_v36 = vsel %vm1472_vm1, %v1670_v1, 0 }
 0x410   :  { %3939 = vpow2.f32 %v1567_v25  ;;  %1856 = vmatpush.bf16.xpose.msra.mxu2 %v1847_v36 }
 0x412   :  { %v3938_v4 = vpop.eup %3937 }
 0x413   :  { %v1595_v5 = vpop.xlane.xlu2 %1594  ;;  %v1598_v54 = vpop.xlane.xlu1 %1597  ;;  %v1639_v7 = vmul.f32 %v3938_v4, %v4527_v55 }
 0x414   :  { %3941 = vrcp.f32 %v1595_v5 }
 0x415   :  { %3943 = vrcp.f32 %v1598_v54  ;;  %1655 = vst.msk [vmem:[#allocation15 + $0x30] sm:$0xff] %vm1472_vm1, %v1639_v7  ;;  %v1671_v44 = vpack.c.bf16 %v1639_v7, %v1639_v7 }
 0x416   :  { %v4593_v11 = vpop.eup %3939 }
 0x417   :  { %v1614_v9 = vsel %vm1472_vm1, %v4593_v11, 0.0  ;;  %v1872_v12 = vsel %vm1472_vm1, %v1671_v44, 0 }
 0x418   :  { %1615 = vadd.xlane.f32.xlu2 %v1614_v9  ;;  %1881 = vmatpush.bf16.xpose.msrb.mxu3 %v1872_v12 }
 0x41a   :  { %v3942_v10 = vpop.eup %3941 }
 0x41b   :  { %v3944_v8 = vpop.eup %3943  ;;  %v1592_v13 = vpop.xlane.xlu2 %1591  ;;  %v1641_v29 = vmul.f32 %v3942_v10, %v4531_v59 }
 0x41c   :  { %3945 = vrcp.f32 %v1592_v13  ;;  %v4600_v55 = vmul.f32 %v3944_v8, %v4534_v18 }
 0x41d   :  { %1657 = vst.msk [vmem:[#allocation15 + $0x40] sm:$0xff] %vm1472_vm1, %v1641_v29  ;;  %v1673_v31 = vpack.c.bf16 %v1641_v29, %v1641_v29 }
 0x41e   :  { %1658 = vst.msk [vmem:[#allocation15 + $0x48] sm:$0xff] %vm1472_vm1, %v4600_v55  ;;  %v1674_v62 = vpack.c.bf16 %v4600_v55, %v4600_v55 }
 0x41f   :  { %v1922_v53 = vsel %vm1472_vm1, %v1673_v31, 0 }
 0x420   :  { %v1947_v44 = vsel %vm1472_vm1, %v1674_v62, 0 }
 0x422   :  { %v3946_v14 = vpop.eup %3945 }
 0x423   :  { %v1601_v33 = vpop.xlane.xlu1 %1600  ;;  %v1640_v15 = vmul.f32 %v3946_v14, %v4541_v6 }
 0x424   :  { %3947 = vrcp.f32 %v1601_v33 }
 0x425   :  { %1656 = vst.msk [vmem:[#allocation15 + $0x38] sm:$0xff] %vm1472_vm1, %v1640_v15  ;;  %v1672_v23 = vpack.c.bf16 %v1640_v15, %v1640_v15 }
 0x427   :  { %v1897_v52 = vsel %vm1472_vm1, %v1672_v23, 0 }
 0x428   :  { %1906 = vmatpush.bf16.xpose.msra.mxu0 %v1897_v52 }
 0x42a   :  { %v3948_v59 = vpop.eup %3947 }
 0x42b   :  { %v1607_v51 = vpop.xlane.xlu1 %1606  ;;  %v4609_v18 = vmul.f32 %v3948_v59, %v4549_v22 }
 0x42c   :  { %3949 = vrcp.f32 %v1607_v51 }
 0x42d   :  { %1659 = vst.msk [vmem:[#allocation15 + $0x50] sm:$0xff] %vm1472_vm1, %v4609_v18  ;;  %v1675_v15 = vpack.c.bf16 %v4609_v18, %v4609_v18 }
 0x432   :  { %v3950_v57 = vpop.eup %3949 }
 0x433   :  { %v1604_v26 = vpop.xlane.xlu2 %1603  ;;  %v4614_v6 = vmul.f32 %v3950_v57, %v4557_v21 }
 0x434   :  { %3951 = vrcp.f32 %v1604_v26 }
 0x435   :  { %1661 = vst.msk [vmem:[#allocation15 + $0x60] sm:$0xff] %vm1472_vm1, %v4614_v6 }
 0x43a   :  { %v3952_v41 = vpop.eup %3951 }
 0x43b   :  { %v1610_v63 = vpop.xlane.xlu2 %1609  ;;  %v1613_v35 = vpop.xlane.xlu1 %1612  ;;  %v4619_v16 = vmul.f32 %v3952_v41, %v4566_v32 }
 0x43c   :  { %3953 = vrcp.f32 %v1610_v63  ;;  %v1972_v63 = vsel %vm1472_vm1, %v1675_v15, 0 }
 0x43d   :  { %3955 = vrcp.f32 %v1613_v35  ;;  %1660 = vst.msk [vmem:[#allocation15 + $0x58] sm:$0xff] %vm1472_vm1, %v4619_v16 }
 0x442   :  { %v3954_v22 = vpop.eup %3953 }
 0x443   :  { %v3956_v20 = vpop.eup %3955  ;;  %v4624_v21 = vmul.f32 %v3954_v22, %v4570_v3 }
 0x444   :  { %v4627_v0 = vmul.f32 %v3956_v20, %v4572_v17 }
 0x445   :  { %1662 = vst.msk [vmem:[#allocation15 + $0x68] sm:$0xff] %vm1472_vm1, %v4624_v21 }
 0x446   :  { %1663 = vst.msk [vmem:[#allocation15 + $0x70] sm:$0xff] %vm1472_vm1, %v4627_v0 }
 0x455   :  { %v3773_v28 = vpop.trf.xlu0 }
 0x456   :  { %v3777_v32 = vunpack.i.h.bf16 %v3773_v28  ;;  %v3774_v49 = vunpack.i.l.bf16 %v3773_v28 }
 0x458   :  { %v1697_v34 = vpack.c.bf16 %v3777_v32, %v3777_v32  ;;  %v1681_v50 = vpack.c.bf16 %v3774_v49, %v3774_v49 }
 0x45a   :  { %v1915_v43 = vunpack.c.l.b16 %v1697_v34  ;;  %v1715_v17 = vunpack.c.l.b16 %v1681_v50 }
 0x45d   :  { %v3778_v2 = vpop.trf.xlu0 }
 0x45e   :  { %v3782_v38 = vunpack.i.h.bf16 %v3778_v2  ;;  %v3779_v40 = vunpack.i.l.bf16 %v3778_v2 }
 0x460   :  { %v1698_v42 = vpack.c.bf16 %v3782_v38, %v3782_v38  ;;  %v1682_v3 = vpack.c.bf16 %v3779_v40, %v3779_v40  ;;  %v1676_v38 = vpack.c.bf16 %v4619_v16, %v4619_v16 }
 0x462   :  { %v1916_v45 = vunpack.c.l.b16 %v1698_v42  ;;  %v1716_v46 = vunpack.c.l.b16 %v1682_v3 }
 0x464   :  { %v1717_v39 = vpack.c.b16 %v1716_v46, %v1715_v17  ;;  %v4633_v19 = vpack.c.b16 %v1916_v45, %v1915_v43 }
 0x465   :  { %v3783_v48 = vpop.trf.xlu0 }
 0x466   :  { %3116 = vmatmul.msk.bf16.vlgmr.msrb.gmra.mxu1 %vm1472_vm1, %v1717_v39  ;;  %v3787_v47 = vunpack.i.h.bf16 %v3783_v48  ;;  %v3784_v27 = vunpack.i.l.bf16 %v3783_v48  ;;  %v1997_v48 = vsel %vm1472_vm1, %v1676_v38, 0 }
 0x467   :  { %1931 = vmatpush.bf16.xpose.msrb.mxu1 %v1922_v53 }
 0x468   :  { %v1699_v37 = vpack.c.bf16 %v3787_v47, %v3787_v47  ;;  %v1683_v24 = vpack.c.bf16 %v3784_v27, %v3784_v27 }
 0x46a   :  { %v1940_v1 = vunpack.c.l.b16 %v1699_v37  ;;  %v1740_v25 = vunpack.c.l.b16 %v1683_v24 }
 0x46d   :  { %v3788_v56 = vpop.trf.xlu0 }
 0x46e   :  { %v3792_v58 = vunpack.i.h.bf16 %v3788_v56  ;;  %v3789_v30 = vunpack.i.l.bf16 %v3788_v56  ;;  %v1677_v56 = vpack.c.bf16 %v4614_v6, %v4614_v6 }
 0x470   :  { %v1700_v60 = vpack.c.bf16 %v3792_v58, %v3792_v58  ;;  %v1684_v61 = vpack.c.bf16 %v3789_v30, %v3789_v30 }
 0x472   :  { %v1941_v36 = vunpack.c.l.b16 %v1700_v60  ;;  %v1741_v4 = vunpack.c.l.b16 %v1684_v61  ;;  %v2022_v60 = vsel %vm1472_vm1, %v1677_v56, 0 }
 0x474   :  { %v1742_v5 = vpack.c.b16 %v1741_v4, %v1740_v25  ;;  %v4639_v54 = vpack.c.b16 %v1941_v36, %v1940_v1 }
 0x475   :  { %v3793_v7 = vpop.trf.xlu0 }
 0x476   :  { %3117 = vmatmul.msk.bf16.vlgmr.msrb.gmra.mxu2 %vm1472_vm1, %v1742_v5  ;;  %v3797_v9 = vunpack.i.h.bf16 %v3793_v7  ;;  %v3794_v12 = vunpack.i.l.bf16 %v3793_v7  ;;  %v1678_v7 = vpack.c.bf16 %v4624_v21, %v4624_v21 }
 0x477   :  { %1956 = vmatpush.bf16.xpose.msrb.mxu2 %v1947_v44 }
 0x478   :  { %v1701_v10 = vpack.c.bf16 %v3797_v9, %v3797_v9  ;;  %v1685_v8 = vpack.c.bf16 %v3794_v12, %v3794_v12  ;;  %v2047_v6 = vsel %vm1472_vm1, %v1678_v7, 0 }
 0x47a   :  { %v1965_v23 = vunpack.c.l.b16 %v1701_v10  ;;  %v1765_v52 = vunpack.c.l.b16 %v1685_v8 }
 0x47d   :  { %v3798_v13 = vpop.trf.xlu0 }
 0x47e   :  { %v3802_v29 = vunpack.i.h.bf16 %v3798_v13  ;;  %v3799_v55 = vunpack.i.l.bf16 %v3798_v13 }
 0x480   :  { %v1702_v14 = vpack.c.bf16 %v3802_v29, %v3802_v29  ;;  %v1686_v33 = vpack.c.bf16 %v3799_v55, %v3799_v55 }
 0x482   :  { %v1966_v59 = vunpack.c.l.b16 %v1702_v14  ;;  %v1766_v51 = vunpack.c.l.b16 %v1686_v33 }
 0x484   :  { %v1767_v57 = vpack.c.b16 %v1766_v51, %v1765_v52  ;;  %v4645_v26 = vpack.c.b16 %v1966_v59, %v1965_v23  ;;  %v1679_v59 = vpack.c.bf16 %v4627_v0, %v4627_v0 }
 0x485   :  { %v3803_v41 = vpop.trf.xlu0 }
 0x486   :  { %3118 = vmatmul.msk.bf16.vlgmr.msra.gmra.mxu3 %vm1472_vm1, %v1767_v57  ;;  %v3807_v35 = vunpack.i.h.bf16 %v3803_v41  ;;  %v3804_v22 = vunpack.i.l.bf16 %v3803_v41 }
 0x487   :  { %1981 = vmatpush.bf16.xpose.msra.mxu3 %v1972_v63  ;;  %v2072_v63 = vsel %vm1472_vm1, %v1679_v59, 0 }
 0x488   :  { %v1703_v28 = vpack.c.bf16 %v3807_v35, %v3807_v35  ;;  %v1687_v32 = vpack.c.bf16 %v3804_v22, %v3804_v22 }
 0x48a   :  { %v1990_v42 = vunpack.c.l.b16 %v1703_v28  ;;  %v1790_v3 = vunpack.c.l.b16 %v1687_v32 }
 0x48b   :  { %v1616_v20 = vpop.xlane.xlu2 %1615 }
 0x48c   :  { %3957 = vrcp.f32 %v1616_v20 }
 0x48d   :  { %v3808_v18 = vpop.trf.xlu0 }
 0x48e   :  { %v3812_v49 = vunpack.i.h.bf16 %v3808_v18  ;;  %v3809_v34 = vunpack.i.l.bf16 %v3808_v18 }
 0x490   :  { %v1704_v50 = vpack.c.bf16 %v3812_v49, %v3812_v49  ;;  %v1688_v2 = vpack.c.bf16 %v3809_v34, %v3809_v34 }
 0x492   :  { %v3958_v40 = vpop.eup %3957  ;;  %v1991_v31 = vunpack.c.l.b16 %v1704_v50  ;;  %v1791_v43 = vunpack.c.l.b16 %v1688_v2 }
 0x493   :  { %v4652_v17 = vmul.f32 %v3958_v40, %v4593_v11 }
 0x494   :  { %v1792_v45 = vpack.c.b16 %v1791_v43, %v1790_v3  ;;  %v4654_v46 = vpack.c.b16 %v1991_v31, %v1990_v42 }
 0x495   :  { %v3813_v39 = vpop.trf.xlu0  ;;  %1664 = vst.msk [vmem:[#allocation15 + $0x78] sm:$0xff] %vm1472_vm1, %v4652_v17 }
 0x496   :  { %3119 = vmatmul.msk.bf16.vlgmr.msrb.gmra.mxu0 %vm1472_vm1, %v1792_v45  ;;  %v3814_v16 = vunpack.i.l.bf16 %v3813_v39  ;;  %v3817_v8 = vunpack.i.h.bf16 %v3813_v39 }
 0x497   :  { %2006 = vmatpush.bf16.xpose.msrb.mxu0 %v1997_v48 }
 0x498   :  { %v1689_v47 = vpack.c.bf16 %v3814_v16, %v3814_v16  ;;  %v1705_v33 = vpack.c.bf16 %v3817_v8, %v3817_v8 }
 0x49a   :  { %v1815_v24 = vunpack.c.l.b16 %v1689_v47  ;;  %v2015_v51 = vunpack.c.l.b16 %v1705_v33 }
 0x49d   :  { %v3818_v53 = vpop.trf.xlu0 }
 0x49e   :  { %v3819_v27 = vunpack.i.l.bf16 %v3818_v53  ;;  %v3822_v12 = vunpack.i.h.bf16 %v3818_v53 }
 0x4a0   :  { %v1690_v37 = vpack.c.bf16 %v3819_v27, %v3819_v27  ;;  %v1706_v13 = vpack.c.bf16 %v3822_v12, %v3822_v12 }
 0x4a2   :  { %v1816_v11 = vunpack.c.l.b16 %v1690_v37  ;;  %v2016_v21 = vunpack.c.l.b16 %v1706_v13 }
 0x4a4   :  { %v1817_v58 = vpack.c.b16 %v1816_v11, %v1815_v24  ;;  %v2017_v57 = vpack.c.b16 %v2016_v21, %v2015_v51 }
 0x4a5   :  { %v3823_v30 = vpop.trf.xlu0 }
 0x4a6   :  { %3120 = vmatmul.msk.bf16.vlgmr.msra.gmra.mxu1 %vm1472_vm1, %v1817_v58  ;;  %v3824_v61 = vunpack.i.l.bf16 %v3823_v30  ;;  %v3827_v20 = vunpack.i.h.bf16 %v3823_v30 }
 0x4a7   :  { %2031 = vmatpush.bf16.xpose.msra.mxu1 %v2022_v60 }
 0x4a8   :  { %v1691_v1 = vpack.c.bf16 %v3824_v61, %v3824_v61  ;;  %v1707_v49 = vpack.c.bf16 %v3827_v20, %v3827_v20 }
 0x4aa   :  { %v1840_v4 = vunpack.c.l.b16 %v1691_v1  ;;  %v2040_v40 = vunpack.c.l.b16 %v1707_v49  ;;  %v3451_v49 = vld [vmem:[#allocation8 + $0x38] sm:$0xff] }
 0x4ad   :  { %v3828_v62 = vpop.trf.xlu0 }
 0x4ae   :  { %v3829_v25 = vunpack.i.l.bf16 %v3828_v62  ;;  %v3832_v35 = vunpack.i.h.bf16 %v3828_v62 }
 0x4b0   :  { %v1692_v36 = vpack.c.bf16 %v3829_v25, %v3829_v25  ;;  %v1708_v28 = vpack.c.bf16 %v3832_v35, %v3832_v35 }
 0x4b2   :  { %v1841_v5 = vunpack.c.l.b16 %v1692_v36  ;;  %v2041_v50 = vunpack.c.l.b16 %v1708_v28 }
 0x4b4   :  { %v1842_v44 = vpack.c.b16 %v1841_v5, %v1840_v4  ;;  %v2042_v3 = vpack.c.b16 %v2041_v50, %v2040_v40  ;;  %v3450_v50 = vld [vmem:[#allocation8 + $0x30] sm:$0xff] }
 0x4b5   :  { %v3833_v9 = vpop.trf.xlu0 }
 0x4b6   :  { %3121 = vmatmul.msk.bf16.vlgmr.msra.gmra.mxu2 %vm1472_vm1, %v1842_v44  ;;  %3124 = vmatmul.msk.bf16.vlgmr.msrb.gmra.mxu1 %vm1472_vm1, %v4633_v19  ;;  %v3834_v10 = vunpack.i.l.bf16 %v3833_v9  ;;  %v3837_v45 = vunpack.i.h.bf16 %v3833_v9 }
 0x4b7   :  { %2056 = vmatpush.bf16.xpose.msra.mxu2 %v2047_v6  ;;  %2246 = vmatpush.bf16.msrb.mxu1 %v3451_v49 }
 0x4b8   :  { %v1693_v55 = vpack.c.bf16 %v3834_v10, %v3834_v10  ;;  %v1709_v48 = vpack.c.bf16 %v3837_v45, %v3837_v45 }
 0x4ba   :  { %v1865_v23 = vunpack.c.l.b16 %v1693_v55  ;;  %v2065_v53 = vunpack.c.l.b16 %v1709_v48 }
 0x4bb   :  { %2247 = vmatpush.bf16.msrb.mxu1 %v3450_v50  ;;  %v3272_v50 = vld [vmem:[#allocation11 + $0xd8] sm:$0xf0] }
 0x4bd   :  { %v3838_v29 = vpop.trf.xlu0 }
 0x4be   :  { %v3839_v14 = vunpack.i.l.bf16 %v3838_v29  ;;  %v3842_v43 = vunpack.i.h.bf16 %v3838_v29 }
 0x4c0   :  { %v1694_v15 = vpack.c.bf16 %v3839_v14, %v3839_v14  ;;  %v1710_v39 = vpack.c.bf16 %v3842_v43, %v3842_v43  ;;  %v3446_v43 = vld [vmem:[#allocation8 + $0x10] sm:$0xff] }
 0x4c2   :  { %v1866_v52 = vunpack.c.l.b16 %v1694_v15  ;;  %v2066_v16 = vunpack.c.l.b16 %v1710_v39  ;;  %v3445_v39 = vld [vmem:[#allocation8 + $0x8] sm:$0xff] }
 0x4c4   :  { %v1867_v19 = vpack.c.b16 %v1866_v52, %v1865_v23 }
 0x4c5   :  { %v3843_v41 = vpop.trf.xlu0 }
 0x4c6   :  { %3122 = vmatmul.msk.bf16.vlgmr.msrb.gmra.mxu3 %vm1472_vm1, %v1867_v19  ;;  %3125 = vmatmul.msk.bf16.vlgmr.msrb.gmra.mxu2 %vm1472_vm1, %v4639_v54  ;;  %v3844_v22 = vunpack.i.l.bf16 %v3843_v41  ;;  %v1680_v54 = vpack.c.bf16 %v4652_v17, %v4652_v17  ;;  %v2067_v17 = vpack.c.b16 %v2066_v16, %v2065_v53  ;;  %v3847_v27 = vunpack.i.h.bf16 %v3843_v41  ;;  %v3444_v53 = vld [vmem:[#allocation8] sm:$0xff] }
 0x4c7   :  { %3128 = vmatmul.msk.bf16.vlgmr.msra.gmra.mxu1 %vm1472_vm1, %v2017_v57  ;;  %2081 = vmatpush.bf16.xpose.msrb.mxu3 %v2072_v63 }
 0x4c8   :  { %v1695_v0 = vpack.c.bf16 %v3844_v22, %v3844_v22  ;;  %v2097_v31 = vsel %vm1472_vm1, %v1680_v54, 0  ;;  %v1711_v37 = vpack.c.bf16 %v3847_v27, %v3847_v27  ;;  %v3448_v54 = vld [vmem:[#allocation8 + $0x20] sm:$0xff] }
 0x4ca   :  { %v1890_v2 = vunpack.c.l.b16 %v1695_v0  ;;  %v2090_v11 = vunpack.c.l.b16 %v1711_v37  ;;  %v3890_v37 = vld [vmem:[#allocation10] ss:$0 sm:$0xff] }
 0x4cd   :  { %v3848_v32 = vpop.trf.xlu0 }
 0x4ce   :  { %v3849_v18 = vunpack.i.l.bf16 %v3848_v32  ;;  %v3852_v47 = vunpack.i.h.bf16 %v3848_v32 }
 0x4d0   :  { %v1696_v34 = vpack.c.bf16 %v3849_v18, %v3849_v18 }
 0x4d2   :  { %v1891_v38 = vunpack.c.l.b16 %v1696_v34 }
 0x4d4   :  { %v1892_v42 = vpack.c.b16 %v1891_v38, %v1890_v2  ;;  %v3449_v38 = vld [vmem:[#allocation8 + $0x28] sm:$0xff] }
 0x4d5   :  { %2248 = vmatpush.bf16.msrb.mxu1 %v3449_v38  ;;  %v3246_v38 = vld [vmem:[#allocation11 + $0xa0] sm:$0xf] }
 0x4d6   :  { %3123 = vmatmul.msk.bf16.vlgmr.msra.gmra.mxu0 %vm1472_vm1, %v1892_v42  ;;  %3126 = vmatmul.msk.bf16.vlgmr.msra.gmra.mxu3 %vm1472_vm1, %v4645_v26  ;;  %v1712_v26 = vpack.c.bf16 %v3852_v47, %v3852_v47 }
 0x4d7   :  { %3129 = vmatmul.msk.bf16.vlgmr.msra.gmra.mxu2 %vm1472_vm1, %v2042_v3  ;;  %2106 = vmatpush.bf16.xpose.msra.mxu0 %v2097_v31  ;;  %v3447_v3 = vld [vmem:[#allocation8 + $0x18] sm:$0xff] }
 0x4d8   :  { %v2091_v24 = vunpack.c.l.b16 %v1712_v26 }
 0x4d9   :  { %2249 = vmatpush.bf16.msrb.mxu1 %v3448_v54  ;;  %v3474_v54 = vld [vmem:[#allocation11 + $0xac] sm:$0xf0] }
 0x4da   :  { %v2092_v56 = vpack.c.b16 %v2091_v24, %v2090_v11 }
 0x4dd   :  { %2250 = vmatpush.bf16.msrb.mxu1 %v3447_v3  ;;  %v3248_v3 = vld [vmem:[#allocation11 + $0xb0] sm:$0xf0] }
 0x4e1   :  { %2251 = vmatpush.bf16.msrb.mxu1 %v3446_v43  ;;  %v3475_v43 = vld [vmem:[#allocation11 + $0xb4] sm:$0xf0] }
 0x4e3   :  { %v1733_v58 = vpop.f32.mrf.mxu1 }
 0x4e5   :  { %2252 = vmatpush.bf16.msrb.mxu1 %v3445_v39 }
 0x4e6   :  { %3127 = vmatmul.msk.bf16.vlgmr.msrb.gmra.mxu0 %vm1472_vm1, %v4654_v46  ;;  %3130 = vmatmul.msk.bf16.vlgmr.msrb.gmra.mxu3 %vm1472_vm1, %v2067_v17 }
 0x4e9   :  { %2253 = vmatpush.bf16.msrb.mxu1 %v3444_v53 }
 0x4eb   :  { %v1735_v30 = vpop.f32.mrf.mxu1 }
 0x4f6   :  { %3131 = vmatmul.msk.bf16.vlgmr.msra.gmra.mxu0 %vm1472_vm1, %v2092_v56  ;;  %v3969_v56 = vld [vmem:[#allocation2] sm:$0xff] }
 0x4f9   :  { %v1758_v61 = vpop.f32.mrf.mxu2 }
 0x501   :  { %v1760_v1 = vpop.f32.mrf.mxu2 }
 0x509   :  { %v1783_v46 = vpop.f32.mrf.mxu3 }
 0x511   :  { %v1785_v44 = vpop.f32.mrf.mxu3 }
 0x513   :  { %v1808_v9 = vpop.f32.mrf.mxu0 }
 0x51b   :  { %v1810_v13 = vpop.f32.mrf.mxu0 }
 0x523   :  { %v1833_v60 = vpop.f32.mrf.mxu1 }
 0x52b   :  { %v1835_v62 = vpop.f32.mrf.mxu1 }
 0x533   :  { %v1933_v25 = vpop.f32.mrf.mxu1 }
 0x534   :  { %v3853_v36 = vpack.i.bf16 %v1933_v25, %v1733_v58 }
 0x536   :  { %3854 = vxpose.xlu0.b32.start [1/16] (narrow) %v3853_v36, 8 }
 0x539   :  { %v1858_v4 = vpop.f32.mrf.mxu2 }
 0x53b   :  { %v1935_v5 = vpop.f32.mrf.mxu1 }
 0x53c   :  { %v3855_v7 = vpack.i.bf16 %v1935_v5, %v1735_v30 }
 0x53e   :  { %3856 = vxpose.xlu0.b32.cont [2/16] (narrow) %v3855_v7, 8 }
 0x541   :  { %v1860_v6 = vpop.f32.mrf.mxu2 }
 0x544   :  { %v2033_v63 = vpop.f32.mrf.mxu1 }
 0x545   :  { %v3869_v35 = vpack.i.bf16 %v2033_v63, %v1833_v60  ;;  %v3262_v63 = vld [vmem:[#allocation11 + $0xc0] sm:$0xf] }
 0x549   :  { %v1883_v12 = vpop.f32.mrf.mxu3  ;;  %v1958_v10 = vpop.f32.mrf.mxu2 }
 0x54a   :  { %v3857_v8 = vpack.i.bf16 %v1958_v10, %v1758_v61  ;;  %v3970_v61 = vld [vmem:[#allocation2 + $0x8] sm:$0xff] }
 0x54c   :  { %3858 = vxpose.xlu0.b32.cont [3/16] (narrow) %v3857_v8, 8  ;;  %v2035_v22 = vpop.f32.mrf.mxu1 }
 0x54d   :  { %v3871_v20 = vpack.i.bf16 %v2035_v22, %v1835_v62  ;;  %v3476_v22 = vld [vmem:[#allocation11 + $0xc4] sm:$0xf] }
 0x551   :  { %v1885_v29 = vpop.f32.mrf.mxu3  ;;  %v1960_v55 = vpop.f32.mrf.mxu2 }
 0x552   :  { %v3859_v14 = vpack.i.bf16 %v1960_v55, %v1760_v1  ;;  %v4214_v1 = vmov 128.0   ;;  %v3278_v55 = vld [vmem:[#allocation11 + $0xe0] sm:$0xf] }
 0x553   :  { %v1908_v33 = vpop.f32.mrf.mxu0  ;;  %3959 = vrcp.f32 %v4214_v1  ;;  %v3466_v1 = vld [vmem:[#allocation11 + $0x6c] sm:$0xf0] }
 0x554   :  { %3860 = vxpose.xlu0.b32.cont [4/16] (narrow) %v3859_v14, 8  ;;  %v3482_v14 = vld [vmem:[#allocation11 + $0xec] sm:$0xf0] }
 0x559   :  { %v1983_v15 = vpop.f32.mrf.mxu3  ;;  %v3960_v25 = vpop.eup %3959 }
 0x55a   :  { %v3861_v21 = vpack.i.bf16 %v1983_v15, %v1783_v46  ;;  %v2058_v28 = vpop.f32.mrf.mxu2  ;;  %v2269_v36 = vmul.f32 128.0, %v3960_v25  ;;  %vm2273_vm2 = vweird.f32 %v3960_v25  ;;  %v3279_v15 = vor.u32 %v3482_v14, %v3278_v55  ;;  %v3462_v55 = vld [vmem:[#allocation11 + $0x4c] sm:$0xf0]  ;;  %v3460_v14 = vld [vmem:[#allocation11 + $0x44] sm:$0xf] }
 0x55b   :  { %v1910_v23 = vpop.f32.mrf.mxu0  ;;  %v3873_v32 = vpack.i.bf16 %v2058_v28, %v1858_v4  ;;  %v3264_v28 = vld [vmem:[#allocation11 + $0xd0] sm:$0xf0] }
 0x55c   :  { %3862 = vxpose.xlu0.b32.cont [5/16] (narrow) %v3861_v21, 8  ;;  %v2270_v46 = vsub.f32 1.0, %v2269_v36  ;;  %v3280_v21 = vld [vmem:[#allocation11 + $0xf0] sm:$0xf0]  ;;  %2524 = vmatpush.bf16.msrb.mxu2 %v3279_v15 }
 0x55d   :  { %v3200_v15 = vld [vmem:[#allocation11 + $0x50] sm:$0xf0] }
 0x55e   :  { %v2271_v4 = vmul.f32 %v3960_v25, %v2270_v46  ;;  %v3216_v46 = vld [vmem:[#allocation11 + $0x70] sm:$0xf0] }
 0x560   :  { %v2272_v5 = vadd.f32 %v3960_v25, %v2271_v4  ;;  %v3222_v4 = vld [vmem:[#allocation11 + $0x68] sm:$0xf] }
 0x561   :  { %v1985_v52 = vpop.f32.mrf.mxu3 }
 0x562   :  { %v3863_v59 = vpack.i.bf16 %v1985_v52, %v1785_v44  ;;  %v2060_v0 = vpop.f32.mrf.mxu2  ;;  %v4688_v7 = vsel %vm2273_vm2, %v3960_v25, %v2272_v5  ;;  %v3483_v52 = vld [vmem:[#allocation11 + $0xf4] sm:$0xf0]  ;;  %v3464_v25 = vld [vmem:[#allocation11 + $0x64] sm:$0xf] }
 0x563   :  { %v2008_v51 = vpop.f32.mrf.mxu0  ;;  %v3875_v18 = vpack.i.bf16 %v2060_v0, %v1860_v6  ;;  %v3479_v0 = vld [vmem:[#allocation11 + $0xd4] sm:$0xf0] }
 0x564   :  { %3864 = vxpose.xlu0.b32.cont [6/16] (narrow) %v3863_v59, 8  ;;  %v3865_v19 = vpack.i.bf16 %v2008_v51, %v1808_v9  ;;  %v3467_v5 = vld [vmem:[#allocation11 + $0x74] sm:$0xf0] }
 0x569   :  { %v2083_v34 = vpop.f32.mrf.mxu3 }
 0x56a   :  { %v3877_v2 = vpack.i.bf16 %v2083_v34, %v1883_v12  ;;  %v3477_v34 = vld [vmem:[#allocation11 + $0xcc] sm:$0xf] }
 0x56b   :  { %v2010_v57 = vpop.f32.mrf.mxu0 }
 0x56c   :  { %3866 = vxpose.xlu0.b32.cont [7/16] (narrow) %v3865_v19, 8  ;;  %v3867_v41 = vpack.i.bf16 %v2010_v57, %v1810_v13  ;;  %v3481_v19 = vld [vmem:[#allocation11 + $0xec] sm:$0xf]  ;;  %v3288_v57 = vld [vmem:[#allocation11 + $0xf8] sm:$0xf0] }
 0x571   :  { %v2085_v40 = vpop.f32.mrf.mxu3 }
 0x572   :  { %v3879_v42 = vpack.i.bf16 %v2085_v40, %v1885_v29  ;;  %v3472_v40 = vld [vmem:[#allocation11 + $0xa4] sm:$0xf] }
 0x573   :  { %v2108_v31 = vpop.f32.mrf.mxu0 }
 0x574   :  { %3868 = vxpose.xlu0.b32.cont [8/16] (narrow) %v3867_v41, 8  ;;  %v3881_v45 = vpack.i.bf16 %v2108_v31, %v1908_v33  ;;  %v3480_v33 = vld [vmem:[#allocation11 + $0xe4] sm:$0xf]  ;;  %v3291_v41 = vor.u32 %v3481_v19, %v3288_v57  ;;  %v3254_v31 = vld [vmem:[#allocation11 + $0xa8] sm:$0xf] }
 0x575   :  { %v3283_v59 = vor.u32 %v3480_v33, %v3280_v21  ;;  %v3255_v39 = vor.u32 %v3475_v43, %v3254_v31  ;;  %v3206_v21 = vld [vmem:[#allocation11 + $0x48] sm:$0xf]  ;;  %v3208_v19 = vld [vmem:[#allocation11 + $0x58] sm:$0xf0] }
 0x576   :  { %2566 = vmatpush.bf16.msra.mxu1 %v3291_v41  ;;  %v3182_v41 = vld [vmem:[#allocation11 + $0x20] sm:$0xf] }
 0x577   :  { %2538 = vmatpush.bf16.msra.mxu3 %v3283_v59 }
 0x57b   :  { %v2110_v48 = vpop.f32.mrf.mxu0 }
 0x57c   :  { %3870 = vxpose.xlu0.b32.cont [9/16] (narrow) %v3869_v35, 8  ;;  %v3883_v16 = vpack.i.bf16 %v2110_v48, %v1910_v23  ;;  %v3286_v23 = vld [vmem:[#allocation11 + $0xe8] sm:$0xf]  ;;  %v3478_v35 = vld [vmem:[#allocation11 + $0xcc] sm:$0xf0] }
 0x57d   :  { %v3287_v51 = vor.u32 %v3483_v52, %v3286_v23  ;;  %v3473_v48 = vld [vmem:[#allocation11 + $0xac] sm:$0xf]  ;;  %v3463_v23 = vld [vmem:[#allocation11 + $0x54] sm:$0xf0]  ;;  %v3203_v52 = vor.u32 %v3460_v14, %v3200_v15 }
 0x57e   :  { %v3207_v59 = vor.u32 %v3463_v23, %v3206_v21  ;;  %v3513_v15 = vld [vmem:[#allocation13 + $0x1d4] sm:$0xf0]  ;;  %v3318_v23 = vld [vmem:[#allocation13 + $0x60] sm:$0xf] }
 0x57f   :  { %2552 = vmatpush.bf16.msrb.mxu0 %v3287_v51  ;;  %v3461_v51 = vld [vmem:[#allocation11 + $0x4c] sm:$0xf] }
 0x580   :  { %v3211_v57 = vor.u32 %v3461_v51, %v3208_v19 }
 0x584   :  { %3872 = vxpose.xlu0.b32.cont [10/16] (narrow) %v3871_v20, 8  ;;  %v3263_v20 = vor.u32 %v3478_v35, %v3262_v63  ;;  %v3458_v63 = vld [vmem:[#allocation11 + $0x2c] sm:$0xf0]  ;;  %v3456_v35 = vld [vmem:[#allocation11 + $0x24] sm:$0xf] }
 0x586   :  { %2525 = vmatpush.bf16.msrb.mxu2 %v3263_v20  ;;  %v3184_v20 = vld [vmem:[#allocation11 + $0x30] sm:$0xf0] }
 0x58c   :  { %3874 = vxpose.xlu0.b32.cont [11/16] (narrow) %v3873_v32, 8  ;;  %v3270_v32 = vld [vmem:[#allocation11 + $0xc8] sm:$0xf] }
 0x58d   :  { %v3271_v49 = vor.u32 %v3479_v0, %v3270_v32  ;;  %v3459_v32 = vld [vmem:[#allocation11 + $0x34] sm:$0xf0] }
 0x58f   :  { %2553 = vmatpush.bf16.msrb.mxu0 %v3271_v49 }
 0x593   :  { %2554 = vmatpush.bf16.msrb.mxu0 %v3255_v39  ;;  %v3455_v39 = vld [vmem:[#allocation11 + $0x14] sm:$0xf0] }
 0x594   :  { %3876 = vxpose.xlu0.b32.cont [12/16] (narrow) %v3875_v18, 8  ;;  %v3267_v18 = vor.u32 %v3476_v22, %v3264_v28  ;;  %v3183_v22 = vor.u32 %v3458_v63, %v3182_v41  ;;  %v3190_v28 = vld [vmem:[#allocation11 + $0x28] sm:$0xf]  ;;  %v3374_v41 = vld [vmem:[#allocation13 + $0x140] sm:$0xf] }
 0x595   :  { %v3191_v49 = vor.u32 %v3459_v32, %v3190_v28  ;;  %v3504_v63 = vld [vmem:[#allocation13 + $0x144] sm:$0xf0]  ;;  %v3406_v28 = vld [vmem:[#allocation13 + $0x1c0] sm:$0xf] }
 0x596   :  { %2539 = vmatpush.bf16.msra.mxu3 %v3267_v18  ;;  %v3187_v18 = vor.u32 %v3456_v35, %v3184_v20  ;;  %v3512_v32 = vld [vmem:[#allocation13 + $0x1c4] sm:$0xf0] }
 0x59c   :  { %3878 = vxpose.xlu0.b32.cont [13/16] (narrow) %v3877_v2, 8  ;;  %v3275_v2 = vor.u32 %v3477_v34, %v3272_v50  ;;  %v3457_v34 = vld [vmem:[#allocation11 + $0x2c] sm:$0xf]  ;;  %v3192_v50 = vld [vmem:[#allocation11 + $0x38] sm:$0xf0] }
 0x59e   :  { %2567 = vmatpush.bf16.msra.mxu1 %v3275_v2  ;;  %v3166_v2 = vld [vmem:[#allocation11] sm:$0xf] }
 0x5a4   :  { %3880 = vxpose.xlu0.b32.cont [14/16] (narrow) %v3879_v42, 8  ;;  %v3247_v42 = vor.u32 %v3474_v54, %v3246_v38  ;;  %v3195_v54 = vor.u32 %v3457_v34, %v3192_v50 }
 0x5a6   :  { %2526 = vmatpush.bf16.msrb.mxu2 %v3247_v42  ;;  %v3452_v42 = vld [vmem:[#allocation11 + $0x4] sm:$0xf] }
 0x5ac   :  { %3882 = vxpose.xlu0.b32.cont [15/16] (narrow) %v3881_v45, 8  ;;  %v3251_v45 = vor.u32 %v3472_v40, %v3248_v3  ;;  %v3454_v40 = vld [vmem:[#allocation11 + $0xc] sm:$0xf0]  ;;  %v3168_v3 = vld [vmem:[#allocation11 + $0x10] sm:$0xf0] }
 0x5ad   :  { %v3167_v31 = vor.u32 %v3454_v40, %v3166_v2  ;;  %v3171_v43 = vor.u32 %v3452_v42, %v3168_v3  ;;  %v3497_v2 = vld [vmem:[#allocation13 + $0xd4] sm:$0xf0] }
 0x5ae   :  { %2540 = vmatpush.bf16.msra.mxu3 %v3251_v45  ;;  %v3174_v45 = vld [vmem:[#allocation11 + $0x8] sm:$0xf] }
 0x5b4   :  { %3884 = vxpose.xlu0.b32.end [16/16] (narrow) %v3883_v16, 8  ;;  %v3256_v16 = vld [vmem:[#allocation11 + $0xb8] sm:$0xf0] }
 0x5b5   :  { %v3259_v53 = vor.u32 %v3473_v48, %v3256_v16  ;;  %v3453_v48 = vld [vmem:[#allocation11 + $0xc] sm:$0xf] }
 0x5b7   :  { %2568 = vmatpush.bf16.msra.mxu1 %v3259_v53  ;;  %v3175_v53 = vor.u32 %v3455_v39, %v3174_v45 }
 0x5e0   :  { %v3885_v17 = vpop.trf.xlu0 }
 0x5e1   :  { %v3889_v47 = vunpack.i.h.bf16 %v3885_v17  ;;  %v3886_v27 = vunpack.i.l.bf16 %v3885_v17  ;;  %v3230_v17 = vld [vmem:[#allocation11 + $0x80] sm:$0xf] }
 0x5e3   :  { %v2194_v26 = vpack.c.bf16 %v3889_v47, %v3886_v27  ;;  %v3470_v47 = vld [vmem:[#allocation11 + $0x8c] sm:$0xf0]  ;;  %v3468_v27 = vld [vmem:[#allocation11 + $0x84] sm:$0xf] }
 0x5e5   :  { %2254 = vmatmul.bf16.vlgmr.msrb.gmra.mxu1 %v2194_v26  ;;  %v3231_v26 = vor.u32 %v3470_v47, %v3230_v17  ;;  %v3176_v17 = vld [vmem:[#allocation11 + $0x18] sm:$0xf0] }
 0x5e6   :  { %v3179_v47 = vor.u32 %v3453_v48, %v3176_v17  ;;  %v3891_v17 = vld [vmem:[%s4772_s9] ss:$0 sm:$0xff] }
 0x5e7   :  { %2527 = vmatpush.bf16.msrb.mxu2 %v3231_v26  ;;  %v3386_v26 = vld [vmem:[#allocation13 + $0x170] sm:$0xf] }
 0x662   :  { %v2255_v24 = vpop.f32.mrf.mxu1 }
 0x663   :  { %v2256_v11 = vadd.f32 %v3890_v37, %v2255_v24  ;;  %v3238_v24 = vld [vmem:[#allocation11 + $0x88] sm:$0xf] }
 0x665   :  { %v2260_v58 = vadd.f32 %v3969_v56, %v2256_v11  ;;  %v3471_v11 = vld [vmem:[#allocation11 + $0x94] sm:$0xf0] }
 0x667   :  { %2264 = vadd.xlane.f32.xlu1 %v2260_v58 }
 0x66a   :  { %v2257_v30 = vpop.f32.mrf.mxu1 }
 0x66b   :  { %v2258_v60 = vadd.f32 %v3890_v37, %v2257_v30  ;;  %v3232_v37 = vld [vmem:[#allocation11 + $0x90] sm:$0xf0]  ;;  %v3469_v30 = vld [vmem:[#allocation11 + $0x8c] sm:$0xf] }
 0x66c   :  { %v3235_v56 = vor.u32 %v3468_v27, %v3232_v37  ;;  %v3507_v37 = vld [vmem:[#allocation13 + $0x174] sm:$0xf0] }
 0x66d   :  { %v2261_v62 = vadd.f32 %v3970_v61, %v2258_v60  ;;  %v3240_v60 = vld [vmem:[#allocation11 + $0x98] sm:$0xf0] }
 0x66e   :  { %v3243_v61 = vor.u32 %v3469_v30, %v3240_v60  ;;  %2541 = vmatpush.bf16.msra.mxu3 %v3235_v56  ;;  %v3387_v56 = vor.u32 %v3507_v37, %v3386_v26  ;;  %v3382_v30 = vld [vmem:[#allocation13 + $0x160] sm:$0xf]  ;;  %v3506_v60 = vld [vmem:[#allocation13 + $0x164] sm:$0xf0] }
 0x66f   :  { %2266 = vadd.xlane.f32.xlu2 %v2261_v62  ;;  %v3892_v37 = vld [vmem:[%s4773_s10] ss:$0 sm:$0xff] }
 0x670   :  { %2569 = vmatpush.bf16.msra.mxu1 %v3243_v61 }
 0x6da   :  { %v2265_v44 = vpop.xlane.xlu1 %2264 }
 0x6db   :  { %v2275_v9 = vmul.f32 %v4688_v7, %v2265_v44  ;;  %v3219_v44 = vor.u32 %v3464_v25, %v3216_v46  ;;  %v3322_v25 = vld [vmem:[#allocation13 + $0x70] sm:$0xf] }
 0x6dd   :  { %v4691_v6 = vsub.f32 %v2260_v58, %v2275_v9  ;;  %v3239_v58 = vor.u32 %v3471_v11, %v3238_v24  ;;  %v3223_v9 = vor.u32 %v3467_v5, %v3222_v4  ;;  %2542 = vmatpush.bf16.msra.mxu3 %v3219_v44  ;;  %v3418_v24 = vld [vmem:[#allocation13 + $0x1f0] sm:$0xf]  ;;  %v3383_v4 = vor.u32 %v3506_v60, %v3382_v30  ;;  %v3491_v5 = vld [vmem:[#allocation13 + $0x74] sm:$0xf0] }
 0x6de   :  { %v3354_v44 = vld [vmem:[#allocation13 + $0xf0] sm:$0xf]  ;;  %v3503_v30 = vld [vmem:[#allocation13 + $0x134] sm:$0xf0] }
 0x6df   :  { %v2279_v12 = vmul.f32 %v4691_v6, %v4691_v6  ;;  %2555 = vmatpush.bf16.msrb.mxu0 %v3239_v58  ;;  %v3515_v58 = vld [vmem:[#allocation13 + $0x1f4] sm:$0xf0] }
 0x6e0   :  { %v3419_v61 = vor.u32 %v3515_v58, %v3418_v24  ;;  %v3370_v58 = vld [vmem:[#allocation13 + $0x130] sm:$0xf] }
 0x6e1   :  { %2281 = vadd.xlane.f32.xlu1 %v2279_v12  ;;  %v3465_v12 = vld [vmem:[#allocation11 + $0x6c] sm:$0xf]  ;;  %2543 = vmatpush.bf16.msra.mxu3 %v3203_v52  ;;  %v3490_v52 = vld [vmem:[#allocation13 + $0x64] sm:$0xf0]  ;;  %v3371_v60 = vor.u32 %v3503_v30, %v3370_v58 }
 0x6e2   :  { %v2267_v10 = vpop.xlane.xlu2 %2266  ;;  %v3319_v19 = vor.u32 %v3490_v52, %v3318_v23  ;;  %v3362_v52 = vld [vmem:[#allocation13 + $0x110] sm:$0xf] }
 0x6e3   :  { %v2276_v8 = vmul.f32 %v4688_v7, %v2267_v10  ;;  %v3224_v10 = vld [vmem:[#allocation11 + $0x78] sm:$0xf0]  ;;  %2556 = vmatpush.bf16.msrb.mxu0 %v3223_v9 }
 0x6e5   :  { %v4696_v13 = vsub.f32 %v2261_v62, %v2276_v8  ;;  %v3214_v62 = vld [vmem:[#allocation11 + $0x60] sm:$0xf]  ;;  %v3227_v8 = vor.u32 %v3465_v12, %v3224_v10  ;;  %2544 = vmatpush.bf16.msra.mxu3 %v3187_v18  ;;  %v3323_v10 = vor.u32 %v3491_v5, %v3322_v25  ;;  %v3489_v18 = vld [vmem:[#allocation13 + $0x54] sm:$0xf0]  ;;  %v3488_v25 = vld [vmem:[#allocation13 + $0x44] sm:$0xf0] }
 0x6e6   :  { %v3215_v36 = vor.u32 %v3466_v1, %v3214_v62  ;;  %v3414_v62 = vld [vmem:[#allocation13 + $0x1e0] sm:$0xf]  ;;  %v3514_v1 = vld [vmem:[#allocation13 + $0x1e4] sm:$0xf0] }
 0x6e7   :  { %v2280_v29 = vmul.f32 %v4696_v13, %v4696_v13  ;;  %2570 = vmatpush.bf16.msra.mxu1 %v3227_v8  ;;  %2557 = vmatpush.bf16.msrb.mxu0 %v3207_v59  ;;  %v3415_v12 = vor.u32 %v3514_v1, %v3414_v62  ;;  %v3499_v8 = vld [vmem:[#allocation13 + $0xf4] sm:$0xf0]  ;;  %v3350_v59 = vld [vmem:[#allocation13 + $0xe0] sm:$0xf] }
 0x6e8   :  { %2528 = vmatpush.bf16.msrb.mxu2 %v3215_v36  ;;  %v3355_v14 = vor.u32 %v3499_v8, %v3354_v44  ;;  %v3310_v1 = vld [vmem:[#allocation13 + $0x40] sm:$0xf]  ;;  %v3510_v8 = vld [vmem:[#allocation13 + $0x1a4] sm:$0xf0] }
 0x6e9   :  { %2283 = vadd.xlane.f32.xlu2 %v2280_v29  ;;  %v3198_v29 = vld [vmem:[#allocation11 + $0x40] sm:$0xf]  ;;  %2545 = vmatpush.bf16.msra.mxu3 %v3171_v43 }
 0x6ea   :  { %v3199_v33 = vor.u32 %v3462_v55, %v3198_v29  ;;  %v3378_v29 = vld [vmem:[#allocation13 + $0x150] sm:$0xf]  ;;  %v3505_v55 = vld [vmem:[#allocation13 + $0x154] sm:$0xf0]  ;;  %v3366_v44 = vld [vmem:[#allocation13 + $0x120] sm:$0xf] }
 0x6eb   :  { %2571 = vmatpush.bf16.msra.mxu1 %v3211_v57  ;;  %2558 = vmatpush.bf16.msrb.mxu0 %v3191_v49  ;;  %v3379_v51 = vor.u32 %v3505_v55, %v3378_v29  ;;  %v3498_v57 = vld [vmem:[#allocation13 + $0xe4] sm:$0xf0]  ;;  %v3346_v49 = vld [vmem:[#allocation13 + $0xd0] sm:$0xf] }
 0x6ec   :  { %2529 = vmatpush.bf16.msrb.mxu2 %v3199_v33  ;;  %v3410_v33 = vld [vmem:[#allocation13 + $0x1d0] sm:$0xf]  ;;  %v3351_v20 = vor.u32 %v3498_v57, %v3350_v59  ;;  %v3347_v40 = vor.u32 %v3497_v2, %v3346_v49  ;;  %v3501_v59 = vld [vmem:[#allocation13 + $0x114] sm:$0xf0]  ;;  %v3390_v49 = vld [vmem:[#allocation13 + $0x180] sm:$0xf] }
 0x6ed   :  { %2866 = vmatpush.bf16.msrb.mxu3 %v3355_v14  ;;  %v3306_v55 = vld [vmem:[#allocation13 + $0x30] sm:$0xf]  ;;  %v3487_v14 = vld [vmem:[#allocation13 + $0x34] sm:$0xf0] }
 0x6ee   :  { %v3509_v57 = vld [vmem:[#allocation13 + $0x194] sm:$0xf0] }
 0x6ef   :  { %2572 = vmatpush.bf16.msra.mxu1 %v3195_v54  ;;  %2559 = vmatpush.bf16.msrb.mxu0 %v3175_v53  ;;  %v3375_v54 = vor.u32 %v3504_v63, %v3374_v41  ;;  %v3302_v63 = vld [vmem:[#allocation13 + $0x20] sm:$0xf] }
 0x6f0   :  { %2530 = vmatpush.bf16.msrb.mxu2 %v3183_v22  ;;  %v3411_v22 = vor.u32 %v3513_v15, %v3410_v33  ;;  %v3307_v33 = vor.u32 %v3487_v14, %v3306_v55  ;;  %v3338_v15 = vld [vmem:[#allocation13 + $0xb0] sm:$0xf] }
 0x6f1   :  { %2867 = vmatpush.bf16.msrb.mxu3 %v3351_v20 }
 0x6f3   :  { %2573 = vmatpush.bf16.msra.mxu1 %v3179_v47  ;;  %2880 = vmatpush.bf16.msra.mxu0 %v3387_v56 }
 0x6f4   :  { %2531 = vmatpush.bf16.msrb.mxu2 %v3167_v31  ;;  %v3407_v31 = vor.u32 %v3512_v32, %v3406_v28  ;;  %v3494_v28 = vld [vmem:[#allocation13 + $0xa4] sm:$0xf0] }
 0x6f5   :  { %2868 = vmatpush.bf16.msrb.mxu3 %v3347_v40  ;;  %v3330_v40 = vld [vmem:[#allocation13 + $0x90] sm:$0xf] }
 0x6f7   :  { %2894 = vmatpush.bf16.msrb.mxu1 %v3419_v61  ;;  %2881 = vmatpush.bf16.msra.mxu0 %v3383_v4  ;;  %v3511_v61 = vld [vmem:[#allocation13 + $0x1b4] sm:$0xf0]  ;;  %v3496_v4 = vld [vmem:[#allocation13 + $0xc4] sm:$0xf0] }
 0x6f8   :  { %2852 = vmatpush.bf16.msra.mxu2 %v3323_v10 }
 0x6fb   :  { %2895 = vmatpush.bf16.msrb.mxu1 %v3415_v12  ;;  %2882 = vmatpush.bf16.msra.mxu0 %v3379_v51  ;;  %v3398_v12 = vld [vmem:[#allocation13 + $0x1a0] sm:$0xf]  ;;  %v3363_v51 = vor.u32 %v3501_v59, %v3362_v52 }
 0x6fc   :  { %2853 = vmatpush.bf16.msra.mxu2 %v3319_v19  ;;  %v3399_v29 = vor.u32 %v3510_v8, %v3398_v12  ;;  %v3394_v19 = vld [vmem:[#allocation13 + $0x190] sm:$0xf] }
 0x6fd   :  { %v3395_v41 = vor.u32 %v3509_v57, %v3394_v19 }
 0x6ff   :  { %2896 = vmatpush.bf16.msrb.mxu1 %v3411_v22  ;;  %2883 = vmatpush.bf16.msra.mxu0 %v3375_v54  ;;  %v3334_v22 = vld [vmem:[#allocation13 + $0xa0] sm:$0xf]  ;;  %v3485_v54 = vld [vmem:[#allocation13 + $0x14] sm:$0xf0] }
 0x700   :  { %v3335_v32 = vor.u32 %v3494_v28, %v3334_v22 }
 0x703   :  { %2897 = vmatpush.bf16.msrb.mxu1 %v3407_v31  ;;  %2884 = vmatpush.bf16.msra.mxu0 %v3371_v60 }
 0x754   :  { %v2282_v0 = vpop.xlane.xlu1 %2281 }
 0x755   :  { %v2285_v38 = vmul.f32 %v2282_v0, %v4688_v7  ;;  %v3314_v0 = vld [vmem:[#allocation13 + $0x50] sm:$0xf] }
 0x756   :  { %v3315_v50 = vor.u32 %v3489_v18, %v3314_v0  ;;  %v3358_v0 = vld [vmem:[#allocation13 + $0x100] sm:$0xf]  ;;  %v3500_v18 = vld [vmem:[#allocation13 + $0x104] sm:$0xf0] }
 0x757   :  { %v4701_v16 = vadd.f32 1e-05, %v2285_v38 }
 0x758   :  { %2854 = vmatpush.bf16.msra.mxu2 %v3315_v50  ;;  %v3508_v50 = vld [vmem:[#allocation13 + $0x184] sm:$0xf0] }
 0x759   :  { %3961 = vrsqrt.f32 %v4701_v16  ;;  %vm2295_vm4 = vweird.f32 %v4701_v16  ;;  %v3391_v2 = vor.u32 %v3508_v50, %v3390_v49 }
 0x75c   :  { %v2284_v27 = vpop.xlane.xlu2 %2283 }
 0x75d   :  { %v2286_v11 = vmul.f32 %v2284_v27, %v4688_v7 }
 0x75f   :  { %v4705_v36 = vpop.eup %3961  ;;  %v4707_v46 = vadd.f32 1e-05, %v2286_v11 }
 0x760   :  { %v2290_v9 = vmul.f32 %v4705_v36, %v4701_v16  ;;  %vm2296_vm3 = vweird.f32 %v4705_v36 }
 0x761   :  { %3963 = vrsqrt.f32 %v4707_v46  ;;  %vm2297_vm5 = vmor %vm2295_vm4, %vm2296_vm3  ;;  %vm2305_vm7 = vweird.f32 %v4707_v46 }
 0x762   :  { %v2291_v21 = vmul.f32 %v4705_v36, %v2290_v9  ;;  %v3502_v9 = vld [vmem:[#allocation13 + $0x124] sm:$0xf0] }
 0x763   :  { %v3367_v10 = vor.u32 %v3502_v9, %v3366_v44 }
 0x764   :  { %v2292_v35 = vmul.f32 0.5, %v2291_v21  ;;  %v3495_v21 = vld [vmem:[#allocation13 + $0xb4] sm:$0xf0] }
 0x765   :  { %2885 = vmatpush.bf16.msra.mxu0 %v3367_v10  ;;  %v3339_v23 = vor.u32 %v3495_v21, %v3338_v15 }
 0x766   :  { %v2293_v34 = vsub.f32 1.5, %v2292_v35  ;;  %v3486_v35 = vld [vmem:[#allocation13 + $0x24] sm:$0xf0] }
 0x767   :  { %v3964_v38 = vpop.eup %3963  ;;  %v3303_v20 = vor.u32 %v3486_v35, %v3302_v63 }
 0x768   :  { %v2294_v42 = vmul.f32 %v4705_v36, %v2293_v34  ;;  %v2300_v3 = vmul.f32 %v3964_v38, %v4707_v46  ;;  %vm2306_vm6 = vweird.f32 %v3964_v38  ;;  %v3342_v46 = vld [vmem:[#allocation13 + $0xc0] sm:$0xf]  ;;  %v3359_v34 = vor.u32 %v3500_v18, %v3358_v0 }
 0x769   :  { %vm2307_vm8 = vmor %vm2305_vm7, %vm2306_vm6  ;;  %v3343_v5 = vor.u32 %v3496_v4, %v3342_v46  ;;  %2886 = vmatpush.bf16.msra.mxu0 %v3363_v51  ;;  %v2652_v51 = vld [vmem:[%s4771_s8] sm:$0x3]  ;;  %s4215_s8 = smov [#allocation15]  }
 0x76a   :  { %v2301_v43 = vmul.f32 %v3964_v38, %v2300_v3  ;;  %v2298_v45 = vsel %vm2297_vm5, %v4705_v36, %v2294_v42  ;;  %v3311_v36 = vor.u32 %v3488_v25, %v3310_v1  ;;  %v3493_v3 = vld [vmem:[#allocation13 + $0x94] sm:$0xf0]  ;;  %v2658_v19 = vperm.slane %v2652_v51, 0  ;;  %s2981_s21 = sshll.u32 %s4215_s8, 4  ;;  %s2982_s21 = int_to_ptr.vmem [resolvable:$true] %s2981_s21 }
 0x76b   :  { %v2309_v53 = vmul.f32 %v2298_v45, %v4691_v6  ;;  %2869 = vmatpush.bf16.msrb.mxu3 %v3343_v5  ;;  %v3331_v31 = vor.u32 %v3493_v3, %v3330_v40  ;;  %v3484_v45 = vld [vmem:[#allocation13 + $0x4] sm:$0xf0]  ;;  %2989 = dma.vmem_to_hbm [thread:$0]  %s2982_s21, 2048, %s2984_s24, [#allocation16], %s4209_s20, %s4209_s20, %s4210_s22  }
 0x76c   :  { %v2302_v39 = vmul.f32 0.5, %v2301_v43  ;;  %2855 = vmatpush.bf16.msra.mxu2 %v3311_v36  ;;  %v3294_v43 = vld [vmem:[#allocation13] sm:$0xf] }
 0x76d   :  { %v2314_v26 = vmul.f32 %v3891_v17, %v2309_v53  ;;  %2887 = vmatpush.bf16.msra.mxu0 %v3359_v34  ;;  %v3492_v53 = vld [vmem:[#allocation13 + $0x84] sm:$0xf0] }
 0x76e   :  { %v2303_v48 = vsub.f32 1.5, %v2302_v39  ;;  %v3326_v39 = vld [vmem:[#allocation13 + $0x80] sm:$0xf] }
 0x76f   :  { %v4727_v11 = vadd.f32 %v3892_v37, %v2314_v26  ;;  %2870 = vmatpush.bf16.msrb.mxu3 %v3339_v23 }
 0x770   :  { %v2304_v47 = vmul.f32 %v3964_v38, %v2303_v48  ;;  %2856 = vmatpush.bf16.msra.mxu2 %v3307_v33  ;;  %v3295_v48 = vor.u32 %v3484_v45, %v3294_v43 }
 0x772   :  { %v2308_v16 = vsel %vm2307_vm8, %v3964_v38, %v2304_v47  ;;  %v3298_v38 = vld [vmem:[#allocation13 + $0x10] sm:$0xf]  ;;  %v2353_v47 = vld [vmem:[%s4769_s6] sm:$0xf] }
 0x773   :  { %v2310_v27 = vmul.f32 %v2308_v16, %v4696_v13  ;;  %v3402_v13 = vld [vmem:[#allocation13 + $0x1b0] sm:$0xf]  ;;  %2871 = vmatpush.bf16.msrb.mxu3 %v3335_v32  ;;  %v3299_v42 = vor.u32 %v3485_v54, %v3298_v38  ;;  %v2358_v26 = vperm.slane %v2353_v47, 2  ;;  %v2357_v60 = vperm.slane %v2353_v47, 1 }
 0x774   :  { %v3403_v62 = vor.u32 %v3511_v61, %v3402_v13  ;;  %2857 = vmatpush.bf16.msra.mxu2 %v3303_v20  ;;  %v2356_v13 = vperm.slane %v2353_v47, 0 }
 0x775   :  { %v2315_v24 = vmul.f32 %v3891_v17, %v2310_v27  ;;  %v3327_v17 = vor.u32 %v3492_v53, %v3326_v39 }
 0x776   :  { %2898 = vmatpush.bf16.msrb.mxu1 %v3403_v62 }
 0x777   :  { %v4729_v6 = vadd.f32 %v3892_v37, %v2315_v24  ;;  %2872 = vmatpush.bf16.msrb.mxu3 %v3331_v31  ;;  %v2359_v37 = vperm.slane %v2353_v47, 3 }
 0x778   :  { %2858 = vmatpush.bf16.msra.mxu2 %v3299_v42 }
 0x779   :  { %v2354_v56 = vpack.c.bf16 %v4729_v6, %v4727_v11 }
 0x77a   :  { %2899 = vmatpush.bf16.msrb.mxu1 %v3399_v29 }
 0x77b   :  { %2532 = vmatmul.bf16.vlgmr.msrb.gmra.mxu2 %v2354_v56  ;;  %2546 = vmatmul.bf16.vlgmr.msra.gmra.mxu3 %v2354_v56 }
 0x77c   :  { %2560 = vmatmul.bf16.vlgmr.msrb.gmra.mxu0 %v2354_v56  ;;  %2574 = vmatmul.bf16.vlgmr.msra.gmra.mxu1 %v2354_v56 }
 0x77d   :  { %2859 = vmatpush.bf16.msra.mxu2 %v3295_v48  ;;  %2873 = vmatpush.bf16.msrb.mxu3 %v3327_v17 }
 0x77e   :  { %2900 = vmatpush.bf16.msrb.mxu1 %v3395_v41 }
 0x782   :  { %2901 = vmatpush.bf16.msrb.mxu1 %v3391_v2 }
 0x7f9   :  { %v2561_v16 = vpop.f32.mrf.mxu0  ;;  %v2575_v27 = vpop.f32.mrf.mxu1 }
 0x7fa   :  { %v2562_v58 = vadd.f32 %v2561_v16, %v2358_v26  ;;  %v2576_v30 = vadd.f32 %v2575_v27, %v2359_v37 }
 0x7fc   :  { %v2582_v36 = vmax.f32 %v2562_v58, 0.0  ;;  %v2583_v46 = vmax.f32 %v2576_v30, 0.0 }
 0x7fe   :  { %v2533_v24 = vpop.f32.mrf.mxu2  ;;  %v2547_v56 = vpop.f32.mrf.mxu3 }
 0x7ff   :  { %v2534_v44 = vadd.f32 %v2533_v24, %v2356_v13  ;;  %v2548_v9 = vadd.f32 %v2547_v56, %v2357_v60 }
 0x801   :  { %v2563_v61 = vpop.f32.mrf.mxu0  ;;  %v2577_v62 = vpop.f32.mrf.mxu1  ;;  %v2580_v33 = vmax.f32 %v2534_v44, 0.0  ;;  %v2581_v15 = vmax.f32 %v2548_v9, 0.0 }
 0x802   :  { %v2564_v1 = vadd.f32 %v2563_v61, %v2358_v26  ;;  %v2578_v25 = vadd.f32 %v2577_v62, %v2359_v37  ;;  %v3893_v62 = vld [vmem:[%s4774_s11] ss:$0 sm:$0xff]  ;;  %s2968_s11 = sshll.u32 %s4216_s1, 4  ;;  %s2969_s11 = int_to_ptr.vmem [resolvable:$true] %s2968_s11 }
 0x804   :  { %v2586_v4 = vmax.f32 %v2564_v1, 0.0  ;;  %v2587_v5 = vmax.f32 %v2578_v25, 0.0 }
 0x806   :  { %v2655_v12 = vpack.c.bf16 %v2586_v4, %v2582_v36  ;;  %v2656_v10 = vpack.c.bf16 %v2587_v5, %v2583_v46  ;;  %v2535_v8 = vpop.f32.mrf.mxu2  ;;  %v2549_v29 = vpop.f32.mrf.mxu3  ;;  %v3894_v36 = vld [vmem:[%s4775_s12] ss:$0 sm:$0xff] }
 0x807   :  { %v2536_v55 = vadd.f32 %v2535_v8, %v2356_v13  ;;  %v2550_v14 = vadd.f32 %v2549_v29, %v2357_v60 }
 0x808   :  { %2888 = vmatmul.bf16.vlgmr.msra.gmra.mxu0 %v2655_v12  ;;  %2902 = vmatmul.bf16.vlgmr.msrb.gmra.mxu1 %v2656_v10 }
 0x809   :  { %v2584_v21 = vmax.f32 %v2536_v55, 0.0  ;;  %v2585_v23 = vmax.f32 %v2550_v14, 0.0 }
 0x80b   :  { %v2653_v52 = vpack.c.bf16 %v2584_v21, %v2580_v33  ;;  %v2654_v59 = vpack.c.bf16 %v2585_v23, %v2581_v15 }
 0x80d   :  { %2860 = vmatmul.bf16.vlgmr.msra.gmra.mxu2 %v2653_v52  ;;  %2874 = vmatmul.bf16.vlgmr.msrb.gmra.mxu3 %v2654_v59 }
 0x885   :  { %v2889_v35 = vpop.f32.mrf.mxu0  ;;  %v2903_v20 = vpop.f32.mrf.mxu1 }
 0x88d   :  { %v2891_v2 = vpop.f32.mrf.mxu0  ;;  %v2905_v54 = vpop.f32.mrf.mxu1 }
 0x890   :  { %v2861_v57 = vpop.f32.mrf.mxu2  ;;  %v2875_v41 = vpop.f32.mrf.mxu3 }
 0x891   :  { %v2862_v63 = vadd.f32 %v2861_v57, %v2658_v19 }
 0x893   :  { %v2876_v22 = vadd.f32 %v2875_v41, %v2862_v63 }
 0x895   :  { %v2890_v28 = vadd.f32 %v2889_v35, %v2876_v22 }
 0x897   :  { %v2904_v32 = vadd.f32 %v2903_v20, %v2890_v28 }
 0x898   :  { %v2863_v0 = vpop.f32.mrf.mxu2  ;;  %v2877_v34 = vpop.f32.mrf.mxu3 }
 0x899   :  { %v2864_v18 = vadd.f32 %v2863_v0, %v2658_v19  ;;  %v2908_v49 = vadd.f32 %v2904_v32, %v4727_v11 }
 0x89b   :  { %v2878_v50 = vadd.f32 %v2877_v34, %v2864_v18  ;;  %2912 = vadd.xlane.f32.xlu1 %v2908_v49 }
 0x89d   :  { %v2892_v38 = vadd.f32 %v2891_v2, %v2878_v50 }
 0x89f   :  { %v2906_v40 = vadd.f32 %v2905_v54, %v2892_v38 }
 0x8a1   :  { %v2909_v42 = vadd.f32 %v2906_v40, %v4729_v6 }
 0x8a3   :  { %2914 = vadd.xlane.f32.xlu2 %v2909_v42 }
 0x90e   :  { %v2913_v3 = vpop.xlane.xlu1 %2912 }
 0x90f   :  { %v2916_v31 = vmul.f32 %v2913_v3, %v4688_v7 }
 0x911   :  { %v2918_v43 = vsub.f32 %v2908_v49, %v2916_v31 }
 0x913   :  { %v2920_v45 = vmul.f32 %v2918_v43, %v2918_v43 }
 0x915   :  { %2922 = vadd.xlane.f32.xlu1 %v2920_v45 }
 0x916   :  { %v2915_v39 = vpop.xlane.xlu2 %2914 }
 0x917   :  { %v2917_v48 = vmul.f32 %v2915_v39, %v4688_v7 }
 0x919   :  { %v2919_v11 = vsub.f32 %v2909_v42, %v2917_v48 }
 0x91b   :  { %v2921_v53 = vmul.f32 %v2919_v11, %v2919_v11 }
 0x91d   :  { %2924 = vadd.xlane.f32.xlu2 %v2921_v53 }
 0x988   :  { %v2923_v6 = vpop.xlane.xlu1 %2922 }
 0x989   :  { %v2926_v17 = vmul.f32 %v2923_v6, %v4688_v7 }
 0x98b   :  { %v2928_v47 = vadd.f32 1e-05, %v2926_v17 }
 0x98d   :  { %3965 = vrsqrt.f32 %v2928_v47  ;;  %vm2936_vm10 = vweird.f32 %v2928_v47 }
 0x990   :  { %v2925_v16 = vpop.xlane.xlu2 %2924 }
 0x991   :  { %v2927_v27 = vmul.f32 %v2925_v16, %v4688_v7 }
 0x993   :  { %v3966_v26 = vpop.eup %3965  ;;  %v2929_v37 = vadd.f32 1e-05, %v2927_v27 }
 0x994   :  { %v2931_v24 = vmul.f32 %v3966_v26, %v2928_v47  ;;  %vm2937_vm9 = vweird.f32 %v3966_v26 }
 0x995   :  { %3967 = vrsqrt.f32 %v2929_v37  ;;  %vm2938_vm11 = vmor %vm2936_vm10, %vm2937_vm9  ;;  %vm2946_vm13 = vweird.f32 %v2929_v37 }
 0x996   :  { %v2932_v56 = vmul.f32 %v3966_v26, %v2931_v24 }
 0x998   :  { %v2933_v58 = vmul.f32 0.5, %v2932_v56 }
 0x99a   :  { %v2934_v30 = vsub.f32 1.5, %v2933_v58 }
 0x99b   :  { %v3968_v13 = vpop.eup %3967 }
 0x99c   :  { %v2935_v60 = vmul.f32 %v3966_v26, %v2934_v30  ;;  %v2941_v61 = vmul.f32 %v3968_v13, %v2929_v37  ;;  %vm2947_vm12 = vweird.f32 %v3968_v13 }
 0x99d   :  { %vm2948_vm14 = vmor %vm2946_vm13, %vm2947_vm12 }
 0x99e   :  { %v2939_v1 = vsel %vm2938_vm11, %v3966_v26, %v2935_v60  ;;  %v2942_v25 = vmul.f32 %v3968_v13, %v2941_v61 }
 0x99f   :  { %v2950_v7 = vmul.f32 %v2939_v1, %v2918_v43 }
 0x9a0   :  { %v2943_v46 = vmul.f32 0.5, %v2942_v25 }
 0x9a1   :  { %v2955_v4 = vmul.f32 %v3893_v62, %v2950_v7 }
 0x9a2   :  { %v2944_v5 = vsub.f32 1.5, %v2943_v46 }
 0x9a3   :  { %v2960_v44 = vadd.f32 %v3894_v36, %v2955_v4 }
 0x9a4   :  { %v2945_v9 = vmul.f32 %v3968_v13, %v2944_v5 }
 0x9a5   :  { %2962 = vst [vmem:[#allocation14] sm:$0xff] %v2960_v44 }
 0x9a6   :  { %v2949_v12 = vsel %vm2948_vm14, %v3968_v13, %v2945_v9 }
 0x9a7   :  { %v2951_v10 = vmul.f32 %v2949_v12, %v2919_v11 }
 0x9a9   :  { %v2956_v8 = vmul.f32 %v3893_v62, %v2951_v10 }
 0x9ab   :  { %v2961_v29 = vadd.f32 %v3894_v36, %v2956_v8 }
 0x9ad   :  { %2963 = vst [vmem:[#allocation14 + $0x8] sm:$0xff] %v2961_v29 }
 0x9ae   :  { %2976 = dma.vmem_to_hbm [thread:$0]  %s2969_s11, 256, %s2971_s29, [#allocation4], %s4209_s20, %s4209_s20, %s4210_s22  }
 0x9af   :  { %4195 = dma.done.wait [#allocation4], 256  }
 0x9b0   :  { %4196 = vsyncadd [#allocation4], 4294967040 }
 0x9b1   :  { %4197 = dma.done.wait [#allocation16], 2048  }
 0x9b2   :  { %4198 = vsyncadd [#allocation16], 4294965248 }
 0x9b3   :  { %2998 = vsyncpa [#allocation3], 1 }
 0x9b4   :  { %2999 = vsyncpa [#allocation6], 1 }
 0x9b5   :  { %3000 = vsyncpa [#allocation9], 1 }
 0x9b6   :  { %3001 = vsyncpa [#allocation12], 1 }
 0x9b7   :  { %3002 = vsyncpa [#allocation4], 1 }
 0x9b8   :  { %3003 = vsyncpa [#allocation16], 1 }

</bundles_post_ra>
